<compile_context>
chip_gen: v6e
topology: v6e:2x2x1
jax: 0.10.0
libtpu: 0.0.40
codegen_flags: <defaults>
</compile_context>

<pallas_src>
import functools

import jax
import jax.numpy as jnp
from jax import lax
from jax.experimental import pallas as pl
from jax.experimental.pallas import tpu as pltpu

KSIZE = 3  # 3x3 convs, padding=1 (same)


def resblock_kernel(x_ref, mask_ref, w1_ref, b1_ref, w2_ref, b2_ref, out_ref,
                    *, W):
    """One batch tile per grid step, lane-dense layout.

    x_ref   : (NC, HW)      input slab, rows = (image, channel), lanes = y*W+x
    mask_ref: (9, 1, HW)    0/1 edge-validity masks per 3x3 tap
    w1/w2   : (9, NC, NC)   block-diagonal per-tap weights (BN scale folded in)
    b1/b2   : (NC, 1)       folded conv-bias + BN bias per row
    out_ref : (NC, HW)
    """
    HW = x_ref.shape[-1]
    x = x_ref[...].astype(jnp.float32)

    def conv3x3(inp, w_ref):
        acc = None
        k = 0
        for dy in (-1, 0, 1):
            for dx in (-1, 0, 1):
                s = dy * W + dx
                if s == 0:
                    tap = inp                      # center tap: no roll, no mask
                else:
                    # roll so lane p holds input pixel (y+dy, x+dx), then zero
                    # the positions whose tap falls outside the image.
                    tap = pltpu.roll(inp, shift=(-s) % HW, axis=1)
                    tap = tap * mask_ref[k]        # (1, HW) broadcast over rows
                part = jnp.dot(w_ref[k], tap,
                               preferred_element_type=jnp.float32,
                               precision=lax.Precision.HIGHEST)
                acc = part if acc is None else acc + part
                k += 1
        return acc

    # conv1 + bn1 + relu   (BN scale folded into w1, bias into b1)
    h = jnp.maximum(conv3x3(x, w1_ref) + b1_ref[...], 0.0)
    # conv2 + bn2 + residual + relu
    y = conv3x3(h, w2_ref) + b2_ref[...] + x
    out_ref[...] = jnp.maximum(y, 0.0).astype(out_ref.dtype)


def residual_block_pallas(x_nchw, w1, b1, w2, b2, bn1, bn2, eps=1e-5,
                          images_per_tile=None):
    """x_nchw: (N, C, H, W); w*: OIHW (C, C, 3, 3); b*: (C,); bn*: dicts."""
    N, C, H, W = x_nchw.shape
    HW = H * W
    if images_per_tile is None:
        images_per_tile = N            # whole batch in one grid step
    assert N % images_per_tile == 0
    NB = images_per_tile
    NC = NB * C

    # Fold conv bias + BatchNorm (eval mode) into per-channel scale / bias.
    s1 = bn1["gamma"] * lax.rsqrt(bn1["var"] + eps)
    bias1 = (b1 - bn1["mean"]) * s1 + bn1["beta"]
    s2 = bn2["gamma"] * lax.rsqrt(bn2["var"] + eps)
    bias2 = (b2 - bn2["mean"]) * s2 + bn2["beta"]

    def taps_blockdiag(w_oihw, scale):
        # Fold BN scale into the output-channel dimension of the conv weight,
        # then build per-tap block-diagonal matrices over the NB images of a tile:
        # Wbd[k, n*C+co, m*C+ci] = delta(n,m) * scale[co] * w[co, ci, kh, kw].
        ws = w_oihw * scale[:, None, None, None]
        taps = jnp.transpose(ws, (2, 3, 0, 1)).reshape(KSIZE * KSIZE, C, C)
        eye = jnp.eye(NB, dtype=taps.dtype)
        bd = jnp.einsum("kab,nm->knamb", taps, eye).reshape(
            KSIZE * KSIZE, NC, NC)
        return bd

    w1_bd = taps_blockdiag(w1, s1)
    w2_bd = taps_blockdiag(w2, s2)
    b1_col = jnp.tile(bias1, NB).reshape(NC, 1).astype(jnp.float32)
    b2_col = jnp.tile(bias2, NB).reshape(NC, 1).astype(jnp.float32)

    # 0/1 validity masks for the 9 taps (row / column edges of the image).
    row = (jnp.arange(HW, dtype=jnp.int32) // W).reshape(1, HW)
    col = (jnp.arange(HW, dtype=jnp.int32) % W).reshape(1, HW)
    mask_list = []
    for dy in (-1, 0, 1):
        for dx in (-1, 0, 1):
            vy = (row + dy >= 0) & (row + dy < H)
            vx = (col + dx >= 0) & (col + dx < W)
            mask_list.append((vy & vx).astype(jnp.float32))
    tap_masks = jnp.stack(mask_list, axis=0).reshape(KSIZE * KSIZE, 1, HW)

    # NCHW -> (N*C, H*W): channels on sublanes, flattened spatial on lanes.
    x_flat = x_nchw.reshape(N * C, HW)

    grid = (N // NB,)
    out_flat = pl.pallas_call(
        functools.partial(resblock_kernel, W=W),
        out_shape=jax.ShapeDtypeStruct((N * C, HW), x_nchw.dtype),
        grid_spec=pltpu.PrefetchScalarGridSpec(
            num_scalar_prefetch=0,
            grid=grid,
            in_specs=[
                pl.BlockSpec((NC, HW), lambda i: (i, 0)),
                pl.BlockSpec((KSIZE * KSIZE, 1, HW), lambda i: (0, 0, 0)),
                pl.BlockSpec((KSIZE * KSIZE, NC, NC), lambda i: (0, 0, 0)),
                pl.BlockSpec((NC, 1), lambda i: (0, 0)),
                pl.BlockSpec((KSIZE * KSIZE, NC, NC), lambda i: (0, 0, 0)),
                pl.BlockSpec((NC, 1), lambda i: (0, 0)),
            ],
            out_specs=pl.BlockSpec((NC, HW), lambda i: (i, 0)),
        ),
        compiler_params=pltpu.CompilerParams(
            dimension_semantics=("parallel",)),
    )(x_flat, tap_masks, w1_bd, b1_col, w2_bd, b2_col)

    return out_flat.reshape(N, C, H, W)


def residual_block_ref(x, w1, b1, w2, b2, bn1, bn2, eps=1e-5):
    """Pure-JAX reference matching the PyTorch forward (eval-mode BN)."""
    def conv(x, w, b):
        y = lax.conv_general_dilated(
            x, w, window_strides=(1, 1), padding=((1, 1), (1, 1)),
            dimension_numbers=("NCHW", "OIHW", "NCHW"),
            precision=lax.Precision.HIGHEST)
        return y + b[None, :, None, None]

    def bn(x, p):
        sc = (p["gamma"] * lax.rsqrt(p["var"] + eps))[None, :, None, None]
        return (x - p["mean"][None, :, None, None]) * sc + p["beta"][None, :, None, None]

    out = jax.nn.relu(bn(conv(x, w1, b1), bn1))
    out = bn(conv(out, w2, b2), bn2)
    return jax.nn.relu(out + x)


if __name__ == "__main__":
    N, C, H, W = 2, 4, 16, 16
    key = jax.random.PRNGKey(0)
    ks = jax.random.split(key, 12)

    x = jax.random.normal(ks[0], (N, C, H, W), jnp.float32)

    # Conv2d(in=C, out=C, k=3, pad=1) parameters (OIHW), deterministic init.
    w1 = 0.1 * jax.random.normal(ks[1], (C, C, KSIZE, KSIZE), jnp.float32)
    b1 = 0.1 * jax.random.normal(ks[2], (C,), jnp.float32)
    w2 = 0.1 * jax.random.normal(ks[3], (C, C, KSIZE, KSIZE), jnp.float32)
    b2 = 0.1 * jax.random.normal(ks[4], (C,), jnp.float32)

    # BatchNorm2d parameters + running stats (eval-mode semantics).
    bn1 = dict(
        gamma=1.0 + 0.1 * jax.random.normal(ks[5], (C,), jnp.float32),
        beta=0.1 * jax.random.normal(ks[6], (C,), jnp.float32),
        mean=0.05 * jax.random.normal(ks[7], (C,), jnp.float32),
        var=1.0 + 0.1 * jnp.abs(jax.random.normal(ks[8], (C,), jnp.float32)),
    )
    bn2 = dict(
        gamma=1.0 + 0.1 * jax.random.normal(ks[9], (C,), jnp.float32),
        beta=0.1 * jax.random.normal(ks[10], (C,), jnp.float32),
        mean=0.05 * jax.random.normal(ks[11], (C,), jnp.float32),
        var=1.0 + 0.1 * jnp.abs(jax.random.normal(ks[0], (C,), jnp.float32)),
    )

    out = residual_block_pallas(x, w1, b1, w2, b2, bn1, bn2)
    out = jax.block_until_ready(out)

    ref = jax.block_until_ready(residual_block_ref(x, w1, b1, w2, b2, bn1, bn2))
    assert out.shape == (N, C, H, W) and out.dtype == jnp.float32
    assert jnp.allclose(out, ref, atol=1e-3, rtol=1e-3), (
        f"max abs err {jnp.max(jnp.abs(out - ref))}")

    print("KERNEL_OK")
</pallas_src>

<mosaic_0001>
module attributes {stable_mosaic.version = 11 : i64} {
  func.func @resblock_kernel(%arg0: i32, %arg1: memref<8x256xf32, #tpu.memory_space<vmem>>, %arg2: memref<9x1x256xf32, #tpu.memory_space<vmem>>, %arg3: memref<9x8x8xf32, #tpu.memory_space<vmem>>, %arg4: memref<8x1xf32, #tpu.memory_space<vmem>>, %arg5: memref<9x8x8xf32, #tpu.memory_space<vmem>>, %arg6: memref<8x1xf32, #tpu.memory_space<vmem>>, %arg7: memref<8x256xf32, #tpu.memory_space<vmem>>) attributes {dimension_semantics = [#tpu.dimension_semantics<parallel>], iteration_bounds = array<i64: 1>, scalar_prefetch = 0 : i64, scratch_operands = 0 : i64, tpu.core_type = #tpu.core_type<tc>, window_params = [{transform_indices = @transform_0, window_bounds = array<i64: 8, 256>}, {pipeline_mode = #tpu.pipeline_mode<synchronous>, transform_indices = @transform_1, window_bounds = array<i64: 9, 1, 256>}, {pipeline_mode = #tpu.pipeline_mode<synchronous>, transform_indices = @transform_2, window_bounds = array<i64: 9, 8, 8>}, {pipeline_mode = #tpu.pipeline_mode<synchronous>, transform_indices = @transform_3, window_bounds = array<i64: 8, 1>}, {pipeline_mode = #tpu.pipeline_mode<synchronous>, transform_indices = @transform_4, window_bounds = array<i64: 9, 8, 8>}, {pipeline_mode = #tpu.pipeline_mode<synchronous>, transform_indices = @transform_5, window_bounds = array<i64: 8, 1>}, {transform_indices = @transform_6, window_bounds = array<i64: 8, 256>}]} {
    %c0 = arith.constant 0 : index
    %c0_0 = arith.constant 0 : index
    %0 = vector.load %arg1[%c0, %c0_0] : memref<8x256xf32, #tpu.memory_space<vmem>>, vector<8x256xf32>
    %c17_i32 = arith.constant 17 : i32
    %1 = tpu.dynamic_rotate %0 by %c17_i32 dim 1 : vector<8x256xf32>, i32 -> vector<8x256xf32>
    %c0_1 = arith.constant 0 : index
    %c0_2 = arith.constant 0 : index
    %c0_3 = arith.constant 0 : index
    %2 = vector.load %arg2[%c0_1, %c0_2, %c0_3] : memref<9x1x256xf32, #tpu.memory_space<vmem>>, vector<1x1x256xf32>
    %3 = vector.shape_cast %2 : vector<1x1x256xf32> to vector<1x256xf32>
    %4 = vector.broadcast %3 : vector<1x256xf32> to vector<8x256xf32>
    %5 = arith.mulf %1, %4 : vector<8x256xf32>
    %c0_4 = arith.constant 0 : index
    %c0_5 = arith.constant 0 : index
    %c0_6 = arith.constant 0 : index
    %6 = vector.load %arg3[%c0_4, %c0_5, %c0_6] : memref<9x8x8xf32, #tpu.memory_space<vmem>>, vector<1x8x8xf32>
    %7 = vector.shape_cast %6 : vector<1x8x8xf32> to vector<8x8xf32>
    %cst = arith.constant dense<0.000000e+00> : vector<8x256xf32>
    %8 = tpu.matmul %7, %5, %cst {dimension_numbers = #tpu.dot_dimension_numbers<[1], [0], [0], [1], [0, 0, 1, 1], [], []>, precision = #tpu.contract_precision<fp32>} : vector<8x8xf32>, vector<8x256xf32>, vector<8x256xf32> -> vector<8x256xf32>
    %c16_i32 = arith.constant 16 : i32
    %9 = tpu.dynamic_rotate %0 by %c16_i32 dim 1 : vector<8x256xf32>, i32 -> vector<8x256xf32>
    %c1 = arith.constant 1 : index
    %c0_7 = arith.constant 0 : index
    %c0_8 = arith.constant 0 : index
    %10 = vector.load %arg2[%c1, %c0_7, %c0_8] : memref<9x1x256xf32, #tpu.memory_space<vmem>>, vector<1x1x256xf32>
    %11 = vector.shape_cast %10 : vector<1x1x256xf32> to vector<1x256xf32>
    %12 = vector.broadcast %11 : vector<1x256xf32> to vector<8x256xf32>
    %13 = arith.mulf %9, %12 : vector<8x256xf32>
    %c1_9 = arith.constant 1 : index
    %c0_10 = arith.constant 0 : index
    %c0_11 = arith.constant 0 : index
    %14 = vector.load %arg3[%c1_9, %c0_10, %c0_11] : memref<9x8x8xf32, #tpu.memory_space<vmem>>, vector<1x8x8xf32>
    %15 = vector.shape_cast %14 : vector<1x8x8xf32> to vector<8x8xf32>
    %cst_12 = arith.constant dense<0.000000e+00> : vector<8x256xf32>
    %16 = tpu.matmul %15, %13, %cst_12 {dimension_numbers = #tpu.dot_dimension_numbers<[1], [0], [0], [1], [0, 0, 1, 1], [], []>, precision = #tpu.contract_precision<fp32>} : vector<8x8xf32>, vector<8x256xf32>, vector<8x256xf32> -> vector<8x256xf32>
    %17 = arith.addf %8, %16 : vector<8x256xf32>
    %c15_i32 = arith.constant 15 : i32
    %18 = tpu.dynamic_rotate %0 by %c15_i32 dim 1 : vector<8x256xf32>, i32 -> vector<8x256xf32>
    %c2 = arith.constant 2 : index
    %c0_13 = arith.constant 0 : index
    %c0_14 = arith.constant 0 : index
    %19 = vector.load %arg2[%c2, %c0_13, %c0_14] : memref<9x1x256xf32, #tpu.memory_space<vmem>>, vector<1x1x256xf32>
    %20 = vector.shape_cast %19 : vector<1x1x256xf32> to vector<1x256xf32>
    %21 = vector.broadcast %20 : vector<1x256xf32> to vector<8x256xf32>
    %22 = arith.mulf %18, %21 : vector<8x256xf32>
    %c2_15 = arith.constant 2 : index
    %c0_16 = arith.constant 0 : index
    %c0_17 = arith.constant 0 : index
    %23 = vector.load %arg3[%c2_15, %c0_16, %c0_17] : memref<9x8x8xf32, #tpu.memory_space<vmem>>, vector<1x8x8xf32>
    %24 = vector.shape_cast %23 : vector<1x8x8xf32> to vector<8x8xf32>
    %cst_18 = arith.constant dense<0.000000e+00> : vector<8x256xf32>
    %25 = tpu.matmul %24, %22, %cst_18 {dimension_numbers = #tpu.dot_dimension_numbers<[1], [0], [0], [1], [0, 0, 1, 1], [], []>, precision = #tpu.contract_precision<fp32>} : vector<8x8xf32>, vector<8x256xf32>, vector<8x256xf32> -> vector<8x256xf32>
    %26 = arith.addf %17, %25 : vector<8x256xf32>
    %c1_i32 = arith.constant 1 : i32
    %27 = tpu.dynamic_rotate %0 by %c1_i32 dim 1 : vector<8x256xf32>, i32 -> vector<8x256xf32>
    %c3 = arith.constant 3 : index
    %c0_19 = arith.constant 0 : index
    %c0_20 = arith.constant 0 : index
    %28 = vector.load %arg2[%c3, %c0_19, %c0_20] : memref<9x1x256xf32, #tpu.memory_space<vmem>>, vector<1x1x256xf32>
    %29 = vector.shape_cast %28 : vector<1x1x256xf32> to vector<1x256xf32>
    %30 = vector.broadcast %29 : vector<1x256xf32> to vector<8x256xf32>
    %31 = arith.mulf %27, %30 : vector<8x256xf32>
    %c3_21 = arith.constant 3 : index
    %c0_22 = arith.constant 0 : index
    %c0_23 = arith.constant 0 : index
    %32 = vector.load %arg3[%c3_21, %c0_22, %c0_23] : memref<9x8x8xf32, #tpu.memory_space<vmem>>, vector<1x8x8xf32>
    %33 = vector.shape_cast %32 : vector<1x8x8xf32> to vector<8x8xf32>
    %cst_24 = arith.constant dense<0.000000e+00> : vector<8x256xf32>
    %34 = tpu.matmul %33, %31, %cst_24 {dimension_numbers = #tpu.dot_dimension_numbers<[1], [0], [0], [1], [0, 0, 1, 1], [], []>, precision = #tpu.contract_precision<fp32>} : vector<8x8xf32>, vector<8x256xf32>, vector<8x256xf32> -> vector<8x256xf32>
    %35 = arith.addf %26, %34 : vector<8x256xf32>
    %c4 = arith.constant 4 : index
    %c0_25 = arith.constant 0 : index
    %c0_26 = arith.constant 0 : index
    %36 = vector.load %arg3[%c4, %c0_25, %c0_26] : memref<9x8x8xf32, #tpu.memory_space<vmem>>, vector<1x8x8xf32>
    %37 = vector.shape_cast %36 : vector<1x8x8xf32> to vector<8x8xf32>
    %cst_27 = arith.constant dense<0.000000e+00> : vector<8x256xf32>
    %38 = tpu.matmul %37, %0, %cst_27 {dimension_numbers = #tpu.dot_dimension_numbers<[1], [0], [0], [1], [0, 0, 1, 1], [], []>, precision = #tpu.contract_precision<fp32>} : vector<8x8xf32>, vector<8x256xf32>, vector<8x256xf32> -> vector<8x256xf32>
    %39 = arith.addf %35, %38 : vector<8x256xf32>
    %c255_i32 = arith.constant 255 : i32
    %40 = tpu.dynamic_rotate %0 by %c255_i32 dim 1 : vector<8x256xf32>, i32 -> vector<8x256xf32>
    %c5 = arith.constant 5 : index
    %c0_28 = arith.constant 0 : index
    %c0_29 = arith.constant 0 : index
    %41 = vector.load %arg2[%c5, %c0_28, %c0_29] : memref<9x1x256xf32, #tpu.memory_space<vmem>>, vector<1x1x256xf32>
    %42 = vector.shape_cast %41 : vector<1x1x256xf32> to vector<1x256xf32>
    %43 = vector.broadcast %42 : vector<1x256xf32> to vector<8x256xf32>
    %44 = arith.mulf %40, %43 : vector<8x256xf32>
    %c5_30 = arith.constant 5 : index
    %c0_31 = arith.constant 0 : index
    %c0_32 = arith.constant 0 : index
    %45 = vector.load %arg3[%c5_30, %c0_31, %c0_32] : memref<9x8x8xf32, #tpu.memory_space<vmem>>, vector<1x8x8xf32>
    %46 = vector.shape_cast %45 : vector<1x8x8xf32> to vector<8x8xf32>
    %cst_33 = arith.constant dense<0.000000e+00> : vector<8x256xf32>
    %47 = tpu.matmul %46, %44, %cst_33 {dimension_numbers = #tpu.dot_dimension_numbers<[1], [0], [0], [1], [0, 0, 1, 1], [], []>, precision = #tpu.contract_precision<fp32>} : vector<8x8xf32>, vector<8x256xf32>, vector<8x256xf32> -> vector<8x256xf32>
    %48 = arith.addf %39, %47 : vector<8x256xf32>
    %c241_i32 = arith.constant 241 : i32
    %49 = tpu.dynamic_rotate %0 by %c241_i32 dim 1 : vector<8x256xf32>, i32 -> vector<8x256xf32>
    %c6 = arith.constant 6 : index
    %c0_34 = arith.constant 0 : index
    %c0_35 = arith.constant 0 : index
    %50 = vector.load %arg2[%c6, %c0_34, %c0_35] : memref<9x1x256xf32, #tpu.memory_space<vmem>>, vector<1x1x256xf32>
    %51 = vector.shape_cast %50 : vector<1x1x256xf32> to vector<1x256xf32>
    %52 = vector.broadcast %51 : vector<1x256xf32> to vector<8x256xf32>
    %53 = arith.mulf %49, %52 : vector<8x256xf32>
    %c6_36 = arith.constant 6 : index
    %c0_37 = arith.constant 0 : index
    %c0_38 = arith.constant 0 : index
    %54 = vector.load %arg3[%c6_36, %c0_37, %c0_38] : memref<9x8x8xf32, #tpu.memory_space<vmem>>, vector<1x8x8xf32>
    %55 = vector.shape_cast %54 : vector<1x8x8xf32> to vector<8x8xf32>
    %cst_39 = arith.constant dense<0.000000e+00> : vector<8x256xf32>
    %56 = tpu.matmul %55, %53, %cst_39 {dimension_numbers = #tpu.dot_dimension_numbers<[1], [0], [0], [1], [0, 0, 1, 1], [], []>, precision = #tpu.contract_precision<fp32>} : vector<8x8xf32>, vector<8x256xf32>, vector<8x256xf32> -> vector<8x256xf32>
    %57 = arith.addf %48, %56 : vector<8x256xf32>
    %c240_i32 = arith.constant 240 : i32
    %58 = tpu.dynamic_rotate %0 by %c240_i32 dim 1 : vector<8x256xf32>, i32 -> vector<8x256xf32>
    %c7 = arith.constant 7 : index
    %c0_40 = arith.constant 0 : index
    %c0_41 = arith.constant 0 : index
    %59 = vector.load %arg2[%c7, %c0_40, %c0_41] : memref<9x1x256xf32, #tpu.memory_space<vmem>>, vector<1x1x256xf32>
    %60 = vector.shape_cast %59 : vector<1x1x256xf32> to vector<1x256xf32>
    %61 = vector.broadcast %60 : vector<1x256xf32> to vector<8x256xf32>
    %62 = arith.mulf %58, %61 : vector<8x256xf32>
    %c7_42 = arith.constant 7 : index
    %c0_43 = arith.constant 0 : index
    %c0_44 = arith.constant 0 : index
    %63 = vector.load %arg3[%c7_42, %c0_43, %c0_44] : memref<9x8x8xf32, #tpu.memory_space<vmem>>, vector<1x8x8xf32>
    %64 = vector.shape_cast %63 : vector<1x8x8xf32> to vector<8x8xf32>
    %cst_45 = arith.constant dense<0.000000e+00> : vector<8x256xf32>
    %65 = tpu.matmul %64, %62, %cst_45 {dimension_numbers = #tpu.dot_dimension_numbers<[1], [0], [0], [1], [0, 0, 1, 1], [], []>, precision = #tpu.contract_precision<fp32>} : vector<8x8xf32>, vector<8x256xf32>, vector<8x256xf32> -> vector<8x256xf32>
    %66 = arith.addf %57, %65 : vector<8x256xf32>
    %c239_i32 = arith.constant 239 : i32
    %67 = tpu.dynamic_rotate %0 by %c239_i32 dim 1 : vector<8x256xf32>, i32 -> vector<8x256xf32>
    %c8 = arith.constant 8 : index
    %c0_46 = arith.constant 0 : index
    %c0_47 = arith.constant 0 : index
    %68 = vector.load %arg2[%c8, %c0_46, %c0_47] : memref<9x1x256xf32, #tpu.memory_space<vmem>>, vector<1x1x256xf32>
    %69 = vector.shape_cast %68 : vector<1x1x256xf32> to vector<1x256xf32>
    %70 = vector.broadcast %69 : vector<1x256xf32> to vector<8x256xf32>
    %71 = arith.mulf %67, %70 : vector<8x256xf32>
    %c8_48 = arith.constant 8 : index
    %c0_49 = arith.constant 0 : index
    %c0_50 = arith.constant 0 : index
    %72 = vector.load %arg3[%c8_48, %c0_49, %c0_50] : memref<9x8x8xf32, #tpu.memory_space<vmem>>, vector<1x8x8xf32>
    %73 = vector.shape_cast %72 : vector<1x8x8xf32> to vector<8x8xf32>
    %cst_51 = arith.constant dense<0.000000e+00> : vector<8x256xf32>
    %74 = tpu.matmul %73, %71, %cst_51 {dimension_numbers = #tpu.dot_dimension_numbers<[1], [0], [0], [1], [0, 0, 1, 1], [], []>, precision = #tpu.contract_precision<fp32>} : vector<8x8xf32>, vector<8x256xf32>, vector<8x256xf32> -> vector<8x256xf32>
    %75 = arith.addf %66, %74 : vector<8x256xf32>
    %c0_52 = arith.constant 0 : index
    %c0_53 = arith.constant 0 : index
    %76 = vector.load %arg4[%c0_52, %c0_53] : memref<8x1xf32, #tpu.memory_space<vmem>>, vector<8x1xf32>
    %77 = vector.broadcast %76 : vector<8x1xf32> to vector<8x256xf32>
    %78 = arith.addf %75, %77 : vector<8x256xf32>
    %cst_54 = arith.constant 0.000000e+00 : f32
    %79 = vector.broadcast %cst_54 : f32 to vector<8x256xf32>
    %80 = arith.maximumf %78, %79 : vector<8x256xf32>
    %c17_i32_55 = arith.constant 17 : i32
    %81 = tpu.dynamic_rotate %80 by %c17_i32_55 dim 1 : vector<8x256xf32>, i32 -> vector<8x256xf32>
    %c0_56 = arith.constant 0 : index
    %c0_57 = arith.constant 0 : index
    %c0_58 = arith.constant 0 : index
    %82 = vector.load %arg2[%c0_56, %c0_57, %c0_58] : memref<9x1x256xf32, #tpu.memory_space<vmem>>, vector<1x1x256xf32>
    %83 = vector.shape_cast %82 : vector<1x1x256xf32> to vector<1x256xf32>
    %84 = vector.broadcast %83 : vector<1x256xf32> to vector<8x256xf32>
    %85 = arith.mulf %81, %84 : vector<8x256xf32>
    %c0_59 = arith.constant 0 : index
    %c0_60 = arith.constant 0 : index
    %c0_61 = arith.constant 0 : index
    %86 = vector.load %arg5[%c0_59, %c0_60, %c0_61] : memref<9x8x8xf32, #tpu.memory_space<vmem>>, vector<1x8x8xf32>
    %87 = vector.shape_cast %86 : vector<1x8x8xf32> to vector<8x8xf32>
    %cst_62 = arith.constant dense<0.000000e+00> : vector<8x256xf32>
    %88 = tpu.matmul %87, %85, %cst_62 {dimension_numbers = #tpu.dot_dimension_numbers<[1], [0], [0], [1], [0, 0, 1, 1], [], []>, precision = #tpu.contract_precision<fp32>} : vector<8x8xf32>, vector<8x256xf32>, vector<8x256xf32> -> vector<8x256xf32>
    %c16_i32_63 = arith.constant 16 : i32
    %89 = tpu.dynamic_rotate %80 by %c16_i32_63 dim 1 : vector<8x256xf32>, i32 -> vector<8x256xf32>
    %c1_64 = arith.constant 1 : index
    %c0_65 = arith.constant 0 : index
    %c0_66 = arith.constant 0 : index
    %90 = vector.load %arg2[%c1_64, %c0_65, %c0_66] : memref<9x1x256xf32, #tpu.memory_space<vmem>>, vector<1x1x256xf32>
    %91 = vector.shape_cast %90 : vector<1x1x256xf32> to vector<1x256xf32>
    %92 = vector.broadcast %91 : vector<1x256xf32> to vector<8x256xf32>
    %93 = arith.mulf %89, %92 : vector<8x256xf32>
    %c1_67 = arith.constant 1 : index
    %c0_68 = arith.constant 0 : index
    %c0_69 = arith.constant 0 : index
    %94 = vector.load %arg5[%c1_67, %c0_68, %c0_69] : memref<9x8x8xf32, #tpu.memory_space<vmem>>, vector<1x8x8xf32>
    %95 = vector.shape_cast %94 : vector<1x8x8xf32> to vector<8x8xf32>
    %cst_70 = arith.constant dense<0.000000e+00> : vector<8x256xf32>
    %96 = tpu.matmul %95, %93, %cst_70 {dimension_numbers = #tpu.dot_dimension_numbers<[1], [0], [0], [1], [0, 0, 1, 1], [], []>, precision = #tpu.contract_precision<fp32>} : vector<8x8xf32>, vector<8x256xf32>, vector<8x256xf32> -> vector<8x256xf32>
    %97 = arith.addf %88, %96 : vector<8x256xf32>
    %c15_i32_71 = arith.constant 15 : i32
    %98 = tpu.dynamic_rotate %80 by %c15_i32_71 dim 1 : vector<8x256xf32>, i32 -> vector<8x256xf32>
    %c2_72 = arith.constant 2 : index
    %c0_73 = arith.constant 0 : index
    %c0_74 = arith.constant 0 : index
    %99 = vector.load %arg2[%c2_72, %c0_73, %c0_74] : memref<9x1x256xf32, #tpu.memory_space<vmem>>, vector<1x1x256xf32>
    %100 = vector.shape_cast %99 : vector<1x1x256xf32> to vector<1x256xf32>
    %101 = vector.broadcast %100 : vector<1x256xf32> to vector<8x256xf32>
    %102 = arith.mulf %98, %101 : vector<8x256xf32>
    %c2_75 = arith.constant 2 : index
    %c0_76 = arith.constant 0 : index
    %c0_77 = arith.constant 0 : index
    %103 = vector.load %arg5[%c2_75, %c0_76, %c0_77] : memref<9x8x8xf32, #tpu.memory_space<vmem>>, vector<1x8x8xf32>
    %104 = vector.shape_cast %103 : vector<1x8x8xf32> to vector<8x8xf32>
    %cst_78 = arith.constant dense<0.000000e+00> : vector<8x256xf32>
    %105 = tpu.matmul %104, %102, %cst_78 {dimension_numbers = #tpu.dot_dimension_numbers<[1], [0], [0], [1], [0, 0, 1, 1], [], []>, precision = #tpu.contract_precision<fp32>} : vector<8x8xf32>, vector<8x256xf32>, vector<8x256xf32> -> vector<8x256xf32>
    %106 = arith.addf %97, %105 : vector<8x256xf32>
    %c1_i32_79 = arith.constant 1 : i32
    %107 = tpu.dynamic_rotate %80 by %c1_i32_79 dim 1 : vector<8x256xf32>, i32 -> vector<8x256xf32>
    %c3_80 = arith.constant 3 : index
    %c0_81 = arith.constant 0 : index
    %c0_82 = arith.constant 0 : index
    %108 = vector.load %arg2[%c3_80, %c0_81, %c0_82] : memref<9x1x256xf32, #tpu.memory_space<vmem>>, vector<1x1x256xf32>
    %109 = vector.shape_cast %108 : vector<1x1x256xf32> to vector<1x256xf32>
    %110 = vector.broadcast %109 : vector<1x256xf32> to vector<8x256xf32>
    %111 = arith.mulf %107, %110 : vector<8x256xf32>
    %c3_83 = arith.constant 3 : index
    %c0_84 = arith.constant 0 : index
    %c0_85 = arith.constant 0 : index
    %112 = vector.load %arg5[%c3_83, %c0_84, %c0_85] : memref<9x8x8xf32, #tpu.memory_space<vmem>>, vector<1x8x8xf32>
    %113 = vector.shape_cast %112 : vector<1x8x8xf32> to vector<8x8xf32>
    %cst_86 = arith.constant dense<0.000000e+00> : vector<8x256xf32>
    %114 = tpu.matmul %113, %111, %cst_86 {dimension_numbers = #tpu.dot_dimension_numbers<[1], [0], [0], [1], [0, 0, 1, 1], [], []>, precision = #tpu.contract_precision<fp32>} : vector<8x8xf32>, vector<8x256xf32>, vector<8x256xf32> -> vector<8x256xf32>
    %115 = arith.addf %106, %114 : vector<8x256xf32>
    %c4_87 = arith.constant 4 : index
    %c0_88 = arith.constant 0 : index
    %c0_89 = arith.constant 0 : index
    %116 = vector.load %arg5[%c4_87, %c0_88, %c0_89] : memref<9x8x8xf32, #tpu.memory_space<vmem>>, vector<1x8x8xf32>
    %117 = vector.shape_cast %116 : vector<1x8x8xf32> to vector<8x8xf32>
    %cst_90 = arith.constant dense<0.000000e+00> : vector<8x256xf32>
    %118 = tpu.matmul %117, %80, %cst_90 {dimension_numbers = #tpu.dot_dimension_numbers<[1], [0], [0], [1], [0, 0, 1, 1], [], []>, precision = #tpu.contract_precision<fp32>} : vector<8x8xf32>, vector<8x256xf32>, vector<8x256xf32> -> vector<8x256xf32>
    %119 = arith.addf %115, %118 : vector<8x256xf32>
    %c255_i32_91 = arith.constant 255 : i32
    %120 = tpu.dynamic_rotate %80 by %c255_i32_91 dim 1 : vector<8x256xf32>, i32 -> vector<8x256xf32>
    %c5_92 = arith.constant 5 : index
    %c0_93 = arith.constant 0 : index
    %c0_94 = arith.constant 0 : index
    %121 = vector.load %arg2[%c5_92, %c0_93, %c0_94] : memref<9x1x256xf32, #tpu.memory_space<vmem>>, vector<1x1x256xf32>
    %122 = vector.shape_cast %121 : vector<1x1x256xf32> to vector<1x256xf32>
    %123 = vector.broadcast %122 : vector<1x256xf32> to vector<8x256xf32>
    %124 = arith.mulf %120, %123 : vector<8x256xf32>
    %c5_95 = arith.constant 5 : index
    %c0_96 = arith.constant 0 : index
    %c0_97 = arith.constant 0 : index
    %125 = vector.load %arg5[%c5_95, %c0_96, %c0_97] : memref<9x8x8xf32, #tpu.memory_space<vmem>>, vector<1x8x8xf32>
    %126 = vector.shape_cast %125 : vector<1x8x8xf32> to vector<8x8xf32>
    %cst_98 = arith.constant dense<0.000000e+00> : vector<8x256xf32>
    %127 = tpu.matmul %126, %124, %cst_98 {dimension_numbers = #tpu.dot_dimension_numbers<[1], [0], [0], [1], [0, 0, 1, 1], [], []>, precision = #tpu.contract_precision<fp32>} : vector<8x8xf32>, vector<8x256xf32>, vector<8x256xf32> -> vector<8x256xf32>
    %128 = arith.addf %119, %127 : vector<8x256xf32>
    %c241_i32_99 = arith.constant 241 : i32
    %129 = tpu.dynamic_rotate %80 by %c241_i32_99 dim 1 : vector<8x256xf32>, i32 -> vector<8x256xf32>
    %c6_100 = arith.constant 6 : index
    %c0_101 = arith.constant 0 : index
    %c0_102 = arith.constant 0 : index
    %130 = vector.load %arg2[%c6_100, %c0_101, %c0_102] : memref<9x1x256xf32, #tpu.memory_space<vmem>>, vector<1x1x256xf32>
    %131 = vector.shape_cast %130 : vector<1x1x256xf32> to vector<1x256xf32>
    %132 = vector.broadcast %131 : vector<1x256xf32> to vector<8x256xf32>
    %133 = arith.mulf %129, %132 : vector<8x256xf32>
    %c6_103 = arith.constant 6 : index
    %c0_104 = arith.constant 0 : index
    %c0_105 = arith.constant 0 : index
    %134 = vector.load %arg5[%c6_103, %c0_104, %c0_105] : memref<9x8x8xf32, #tpu.memory_space<vmem>>, vector<1x8x8xf32>
    %135 = vector.shape_cast %134 : vector<1x8x8xf32> to vector<8x8xf32>
    %cst_106 = arith.constant dense<0.000000e+00> : vector<8x256xf32>
    %136 = tpu.matmul %135, %133, %cst_106 {dimension_numbers = #tpu.dot_dimension_numbers<[1], [0], [0], [1], [0, 0, 1, 1], [], []>, precision = #tpu.contract_precision<fp32>} : vector<8x8xf32>, vector<8x256xf32>, vector<8x256xf32> -> vector<8x256xf32>
    %137 = arith.addf %128, %136 : vector<8x256xf32>
    %c240_i32_107 = arith.constant 240 : i32
    %138 = tpu.dynamic_rotate %80 by %c240_i32_107 dim 1 : vector<8x256xf32>, i32 -> vector<8x256xf32>
    %c7_108 = arith.constant 7 : index
    %c0_109 = arith.constant 0 : index
    %c0_110 = arith.constant 0 : index
    %139 = vector.load %arg2[%c7_108, %c0_109, %c0_110] : memref<9x1x256xf32, #tpu.memory_space<vmem>>, vector<1x1x256xf32>
    %140 = vector.shape_cast %139 : vector<1x1x256xf32> to vector<1x256xf32>
    %141 = vector.broadcast %140 : vector<1x256xf32> to vector<8x256xf32>
    %142 = arith.mulf %138, %141 : vector<8x256xf32>
    %c7_111 = arith.constant 7 : index
    %c0_112 = arith.constant 0 : index
    %c0_113 = arith.constant 0 : index
    %143 = vector.load %arg5[%c7_111, %c0_112, %c0_113] : memref<9x8x8xf32, #tpu.memory_space<vmem>>, vector<1x8x8xf32>
    %144 = vector.shape_cast %143 : vector<1x8x8xf32> to vector<8x8xf32>
    %cst_114 = arith.constant dense<0.000000e+00> : vector<8x256xf32>
    %145 = tpu.matmul %144, %142, %cst_114 {dimension_numbers = #tpu.dot_dimension_numbers<[1], [0], [0], [1], [0, 0, 1, 1], [], []>, precision = #tpu.contract_precision<fp32>} : vector<8x8xf32>, vector<8x256xf32>, vector<8x256xf32> -> vector<8x256xf32>
    %146 = arith.addf %137, %145 : vector<8x256xf32>
    %c239_i32_115 = arith.constant 239 : i32
    %147 = tpu.dynamic_rotate %80 by %c239_i32_115 dim 1 : vector<8x256xf32>, i32 -> vector<8x256xf32>
    %c8_116 = arith.constant 8 : index
    %c0_117 = arith.constant 0 : index
    %c0_118 = arith.constant 0 : index
    %148 = vector.load %arg2[%c8_116, %c0_117, %c0_118] : memref<9x1x256xf32, #tpu.memory_space<vmem>>, vector<1x1x256xf32>
    %149 = vector.shape_cast %148 : vector<1x1x256xf32> to vector<1x256xf32>
    %150 = vector.broadcast %149 : vector<1x256xf32> to vector<8x256xf32>
    %151 = arith.mulf %147, %150 : vector<8x256xf32>
    %c8_119 = arith.constant 8 : index
    %c0_120 = arith.constant 0 : index
    %c0_121 = arith.constant 0 : index
    %152 = vector.load %arg5[%c8_119, %c0_120, %c0_121] : memref<9x8x8xf32, #tpu.memory_space<vmem>>, vector<1x8x8xf32>
    %153 = vector.shape_cast %152 : vector<1x8x8xf32> to vector<8x8xf32>
    %cst_122 = arith.constant dense<0.000000e+00> : vector<8x256xf32>
    %154 = tpu.matmul %153, %151, %cst_122 {dimension_numbers = #tpu.dot_dimension_numbers<[1], [0], [0], [1], [0, 0, 1, 1], [], []>, precision = #tpu.contract_precision<fp32>} : vector<8x8xf32>, vector<8x256xf32>, vector<8x256xf32> -> vector<8x256xf32>
    %155 = arith.addf %146, %154 : vector<8x256xf32>
    %c0_123 = arith.constant 0 : index
    %c0_124 = arith.constant 0 : index
    %156 = vector.load %arg6[%c0_123, %c0_124] : memref<8x1xf32, #tpu.memory_space<vmem>>, vector<8x1xf32>
    %157 = vector.broadcast %156 : vector<8x1xf32> to vector<8x256xf32>
    %158 = arith.addf %155, %157 : vector<8x256xf32>
    %159 = arith.addf %158, %0 : vector<8x256xf32>
    %cst_125 = arith.constant 0.000000e+00 : f32
    %160 = vector.broadcast %cst_125 : f32 to vector<8x256xf32>
    %161 = arith.maximumf %159, %160 : vector<8x256xf32>
    %c0_126 = arith.constant 0 : index
    %c0_127 = arith.constant 0 : index
    %162 = vector.load %arg7[%c0_126, %c0_127] : memref<8x256xf32, #tpu.memory_space<vmem>>, vector<8x256xf32>
    tpu.vector_store %arg7[%c0_126, %c0_127], %161 {strides = array<i32>} : memref<8x256xf32, #tpu.memory_space<vmem>>, vector<8x256xf32>,
    return
  }
  func.func @transform_0(%arg0: i32) -> (i32, i32) {
    %c0_i32 = arith.constant 0 : i32
    %c0_i32_0 = arith.constant 0 : i32
    return %arg0, %c0_i32 : i32, i32
  }
  func.func @transform_1(%arg0: i32) -> (i32, i32, i32) {
    %c0_i32 = arith.constant 0 : i32
    %c0_i32_0 = arith.constant 0 : i32
    %c0_i32_1 = arith.constant 0 : i32
    %c0_i32_2 = arith.constant 0 : i32
    return %c0_i32, %c0_i32_0, %c0_i32_1 : i32, i32, i32
  }
  func.func @transform_2(%arg0: i32) -> (i32, i32, i32) {
    %c0_i32 = arith.constant 0 : i32
    %c0_i32_0 = arith.constant 0 : i32
    %c0_i32_1 = arith.constant 0 : i32
    %c0_i32_2 = arith.constant 0 : i32
    return %c0_i32, %c0_i32_0, %c0_i32_1 : i32, i32, i32
  }
  func.func @transform_3(%arg0: i32) -> (i32, i32) {
    %c0_i32 = arith.constant 0 : i32
    %c0_i32_0 = arith.constant 0 : i32
    %c0_i32_1 = arith.constant 0 : i32
    return %c0_i32, %c0_i32_0 : i32, i32
  }
  func.func @transform_4(%arg0: i32) -> (i32, i32, i32) {
    %c0_i32 = arith.constant 0 : i32
    %c0_i32_0 = arith.constant 0 : i32
    %c0_i32_1 = arith.constant 0 : i32
    %c0_i32_2 = arith.constant 0 : i32
    return %c0_i32, %c0_i32_0, %c0_i32_1 : i32, i32, i32
  }
  func.func @transform_5(%arg0: i32) -> (i32, i32) {
    %c0_i32 = arith.constant 0 : i32
    %c0_i32_0 = arith.constant 0 : i32
    %c0_i32_1 = arith.constant 0 : i32
    return %c0_i32, %c0_i32_0 : i32, i32
  }
  func.func @transform_6(%arg0: i32) -> (i32, i32) {
    %c0_i32 = arith.constant 0 : i32
    %c0_i32_0 = arith.constant 0 : i32
    return %arg0, %c0_i32 : i32, i32
  }
}

</mosaic_0001>

<bundles_post_ra>
// kernel: tpu_custom_call.1
= control target key start
LH: loop header
LB: loop body
LE: loop exit
PB: predicated region body
PF: predicated region fallthrough
CT: control target
= control target key end

     0   :  { %s8851_s23 = smov 16   ;;  %s8852_s24 = smov 17   ;;  %v10009_v2 = vmov 0.0   ;;  %s10002_s0 = inlined_call_operand.vmem [shape: f32[8,256], index: 0, kind: input, shape index: {}]   ;;  %s10003_s1 = inlined_call_operand.vmem [shape: f32[9,1,256], index: 1, kind: input, shape index: {}]   ;;  %s10004_s2 = inlined_call_operand.vmem [shape: f32[9,8,8], index: 2, kind: input, shape index: {}]   ;;  %s10005_s3 = inlined_call_operand.vmem [shape: f32[8,1], index: 3, kind: input, shape index: {}]   ;;  %s10006_s4 = inlined_call_operand.vmem [shape: f32[9,8,8], index: 4, kind: input, shape index: {}]   ;;  %s10007_s5 = inlined_call_operand.vmem [shape: f32[8,1], index: 5, kind: input, shape index: {}]   ;;  %s10008_s6 = inlined_call_operand.hbm [shape: f32[8,256], index: 6, kind: output, shape index: {}]  }
   0x1   :  { %v8900_v0 = vld [vmem:[%s10002_s0] sm:$0xff]  ;;  %v8909_v1 = vld [vmem:[%s10002_s0 + $0x8] sm:$0xff]  ;;  %144 = vmatprep.mubr.f32.mxu0 %v10009_v2  ;;  %230 = vmatprep.mubr.f32.mxu1 %v10009_v2 }
   0x2   :  { %50 = vrot.lane.b32.xlu0 %v8900_v0, %s8851_s23  ;;  %26 = vrot.lane.b32.xlu1 %v8900_v0, %s8852_s24 }
   0x3   :  { %11 = vsyncpa [#allocation3], 0  ;;  %s8854_s27 = smov 15   ;;  %s8855_s28 = smov 1   ;;  %v8793_v3 = vld [vmem:[%s10004_s2 + $0x8] sm:$0xff]  ;;  %vm74_vm0 = vcmask 64512   ;;  %v30_v5 = vlaneseq }
   0x4   :  { %s8856_s29 = smov 127   ;;  %s8857_s30 = smov 113   ;;  %v76_v4 = vsel %vm74_vm0, %v8793_v3, 0  ;;  %v4447_v9 = vld [vmem:[%s10005_s3] sm:$0xff]  ;;  %v8860_v11 = vmov 0   ;;  %v8795_v50 = vld [vmem:[%s10004_s2 + $0x10] sm:$0xff] }
   0x5   :  { %s8858_s7 = smov 112   ;;  %s8859_s8 = smov 111   ;;  %v8945_v6 = vand.u32 4294901760, %v76_v4  ;;  %v38_v7 = vshrl.u32 %v30_v5, 7  ;;  %v8953_v10 = vand.u32 127, %v30_v5  ;;  %8826 = vset.pattern.permute.xlu0 %v8860_v11  ;;  %v49_v14 = vld [vmem:[%s10004_s2] sm:$0xff] }
   0x6   :  { %52 = vrot.lane.b32.xlu0 %v8909_v1, %s8851_s23  ;;  %28 = vrot.lane.b32.xlu1 %v8909_v1, %s8852_s24  ;;  %v8792_v15 = vld [vmem:[%s10003_s1 + $0x2] sm:$0x3]  ;;  %v35_v16 = vld [vmem:[%s10003_s1] sm:$0x3]  ;;  %v544_v20 = vsel %vm74_vm0, %v49_v14, 0  ;;  %v1036_v58 = vsel %vm74_vm0, %v8795_v50, 0 }
   0x7   :  { %v8948_v8 = vsub.f32 %v76_v4, %v8945_v6  ;;  %10029 = vst [vmem:[#allocation5_spill] sm:$0xff] %v8953_v10  ;;  %v8955_v12 = vsub.s32 0, %v38_v7  ;;  %v8957_v13 = vsub.s32 1, %v38_v7  ;;  %vm54_vm1 = vcmp.lt.s32.totalorder %v8953_v10, 16  ;;  %v8794_v38 = vld [vmem:[%s10003_s1 + $0x4] sm:$0x3] }
   0x8   :  { %vm32_vm2 = vcmp.lt.s32.totalorder %v8953_v10, 17  ;;  %v8987_v28 = vand.u32 4294901760, %v544_v20  ;;  %vm1015_vm3 = vcmp.lt.s32.totalorder %v8953_v10, 15  ;;  %v9040_v5 = vand.u32 4294901760, %v1036_v58  ;;  %v8796_v14 = vld [vmem:[%s10003_s1 + $0x6] sm:$0x3] }
   0x9   :  { %v147_v17 = vand.u32 4294901760, %v8948_v8  ;;  %v8972_v21 = vrot.slane %v8792_v15, %v8955_v12  ;;  %v8975_v22 = vrot.slane %v8792_v15, %v8957_v13  ;;  %v8979_v23 = vrot.slane %v35_v16, %v8957_v13  ;;  %s8861_s20 = smov [#allocation2]  }
   0xa   :  { %1013 = vrot.lane.b32.xlu1 %v8909_v1, %s8854_s27  ;;  %1011 = vrot.lane.b32.xlu0 %v8900_v0, %s8854_s27  ;;  %v8982_v24 = vrot.slane %v35_v16, %v8955_v12  ;;  %v9010_v44 = vsub.f32 %v544_v20, %v8987_v28  ;;  %v9014_v47 = vrot.slane %v8794_v38, %v8957_v13  ;;  %vm1509_vm4 = vcmp.lt.s32.totalorder %v8953_v10, 1  ;;  %s8784_s21 = sshll.u32 %s8861_s20, 4  ;;  %s8785_s21 = int_to_ptr.vmem [resolvable:$true] %s8784_s21 }
   0xb   :  { %10030 = vst [vmem:[#allocation6_spill] sm:$0xff] %v8972_v21  ;;  %10031 = vst [vmem:[#allocation7_spill] sm:$0xff] %v8975_v22  ;;  %v148_v25 = vsub.f32 %v8948_v8, %v147_v17  ;;  %v9031_v60 = vrot.slane %v8794_v38, %v8955_v12  ;;  %v9054_v20 = vsub.f32 %v1036_v58, %v9040_v5  ;;  %vm2475_vm5 = vcmp.lt.s32.totalorder %v8953_v10, 127  ;;  %s8829_s26 = scalar_lea.vmem %s8785_s21, 256  ;;  %p8834_p1 = scmp.lt.s32.totalorder %s8785_s21, %s8785_s21 }
   0xc   :  { %10032 = vst [vmem:[#allocation8_spill] sm:$0xff] %v8979_v23  ;;  %10033 = vst [vmem:[#allocation9_spill] sm:$0xff] %v8982_v24  ;;  %v615_v54 = vand.u32 4294901760, %v9010_v44  ;;  %vm2969_vm6 = vcmp.lt.s32.totalorder %v8953_v10, 113  ;;  %vm3463_vm7 = vcmp.lt.s32.totalorder %v8953_v10, 112  ;;  %vm3957_vm8 = vcmp.lt.s32.totalorder %v8953_v10, 111  ;;  %p8830_p0 = scmp.ne.s32.totalorder %s8785_s21, %s8829_s26  ;;  %p8835_p2 = scmp.lt.s32.totalorder %s8829_s26, %s8829_s26 }
   0xd   :  { %v149_v37 = vand.u32 4294901760, %v148_v25  ;;  %10034 = vst [vmem:[#allocation10_spill] sm:$0xff] %v9014_v47  ;;  %10035 = vst [vmem:[#allocation11_spill] sm:$0xff] %v9031_v60 }
   0xe   :  { %1507 = vrot.lane.b32.xlu1 %v8909_v1, %s8855_s28  ;;  %1505 = vrot.lane.b32.xlu0 %v8900_v0, %s8855_s28  ;;  %v616_v4 = vsub.f32 %v9010_v44, %v615_v54  ;;  %p8836_p3 = por %p8835_p2, %p8834_p1 }
  0x10   :  { %p8837_p4 = pnand %p8836_p3, %p8830_p0 }
  0x12   :  { %2473 = vrot.lane.b32.xlu1 %v8909_v1, %s8856_s29  ;;  %2471 = vrot.lane.b32.xlu0 %v8900_v0, %s8856_s29 }
  0x16   :  { %2967 = vrot.lane.b32.xlu1 %v8909_v1, %s8857_s30  ;;  %2965 = vrot.lane.b32.xlu0 %v8900_v0, %s8857_s30 }
  0x1a   :  { %3461 = vrot.lane.b32.xlu1 %v8909_v1, %s8858_s7  ;;  %3459 = vrot.lane.b32.xlu0 %v8900_v0, %s8858_s7 }
  0x1e   :  { %3955 = vrot.lane.b32.xlu1 %v8909_v1, %s8859_s8  ;;  %3953 = vrot.lane.b32.xlu0 %v8900_v0, %s8859_s8 }
  0x22   :  { %4450 = vperm.xlu0 %8826, %v4447_v9  }
  0x74   :  { %v51_v18 = vpop.permute.xlu0 %50  ;;  %v27_v19 = vpop.permute.xlu1 %26 }
  0x78   :  { %v53_v26 = vpop.permute.xlu0 %52  ;;  %v29_v27 = vpop.permute.xlu1 %28 }
  0x79   :  { %v55_v29 = vsel %vm54_vm1, %v51_v18, %v53_v26  ;;  %v56_v30 = vsel %vm54_vm1, %v53_v26, %v51_v18  ;;  %v33_v31 = vsel %vm32_vm2, %v27_v19, %v29_v27  ;;  %v34_v32 = vsel %vm32_vm2, %v29_v27, %v27_v19 }
  0x7a   :  { %v70_v33 = vmul.f32 %v8972_v21, %v56_v30  ;;  %v71_v34 = vmul.f32 %v8975_v22, %v55_v29  ;;  %v48_v35 = vmul.f32 %v8979_v23, %v33_v31  ;;  %v47_v36 = vmul.f32 %v8982_v24, %v34_v32  ;;  %v8797_v31 = vld [vmem:[%s10004_s2 + $0x18] sm:$0xff] }
  0x7b   :  { %v617_v19 = vand.u32 4294901760, %v616_v4  ;;  %v9061_v26 = vrot.slane %v8796_v14, %v8957_v13 }
  0x7c   :  { %v108_v39 = vand.u32 4294901760, %v71_v34  ;;  %v9004_v40 = vand.u32 4294901760, %v70_v33  ;;  %v9006_v41 = vand.u32 4294901760, %v48_v35  ;;  %v1014_v42 = vpop.permute.xlu1 %1013  ;;  %v1012_v43 = vpop.permute.xlu0 %1011  ;;  %v9016_v48 = vand.u32 4294901760, %v47_v36 }
  0x7d   :  { %v1016_v49 = vsel %vm1015_vm3, %v1012_v43, %v1014_v42  ;;  %v1017_v63 = vsel %vm1015_vm3, %v1014_v42, %v1012_v43  ;;  %10036 = vst [vmem:[#allocation12_spill] sm:$0xff] %v9061_v26 }
  0x7e   :  { %v193_v45 = vsub.f32 %v70_v33, %v9004_v40  ;;  %109 = vmatprep.subr.mxu0 %v108_v39  ;;  %v187_v46 = vsub.f32 %v71_v34, %v108_v39  ;;  %v655_v53 = vsub.f32 %v48_v35, %v9006_v41  ;;  %v1032_v57 = vmul.f32 %v9014_v47, %v1016_v49 }
  0x7f   :  { %111 = vmatpush1.msra.mxu0 %v9004_v40  ;;  %v661_v59 = vsub.f32 %v47_v36, %v9016_v48  ;;  %v1031_v11 = vmul.f32 %v9031_v60, %v1017_v63  ;;  %v1107_v33 = vand.u32 4294901760, %v9054_v20  ;;  %v1530_v36 = vsel %vm74_vm0, %v8797_v31, 0 }
  0x80   :  { %150 = vmatmul.mubr.f32.vlgmr.msra.gmra.mxu0 %v149_v37  ;;  %270 = vmatprep.subr.mxu0 %v187_v46  ;;  %v188_v51 = vand.u32 4294901760, %v187_v46  ;;  %v194_v52 = vand.u32 4294901760, %v193_v45  ;;  %v656_v3 = vand.u32 4294901760, %v655_v53  ;;  %v9043_v7 = vand.u32 4294901760, %v1032_v57  ;;  %v1508_v16 = vpop.permute.xlu1 %1507  ;;  %v1506_v18 = vpop.permute.xlu0 %1505 }
  0x81   :  { %273 = vmatpush1.msra.mxu0 %v193_v45  ;;  %306 = vmatprep.mubr.f32.mxu0 %v10009_v2  ;;  %v662_v9 = vand.u32 4294901760, %v661_v59  ;;  %v9064_v27 = vand.u32 4294901760, %v1031_v11  ;;  %v1510_v30 = vsel %vm1509_vm4, %v1506_v18, %v1508_v16  ;;  %v1511_v38 = vsel %vm1509_vm4, %v1508_v16, %v1506_v18 }
  0x82   :  { %424 = vmatprep.subr.mxu0 %v188_v51  ;;  %v189_v55 = vsub.f32 %v187_v46, %v188_v51  ;;  %v195_v56 = vsub.f32 %v193_v45, %v194_v52  ;;  %v657_v15 = vsub.f32 %v655_v53, %v656_v3  ;;  %v9058_v25 = vsub.f32 %v1032_v57, %v9043_v7 }
  0x83   :  { %v663_v29 = vsub.f32 %v661_v59, %v662_v9  ;;  %v1526_v34 = vmul.f32 %v9061_v26, %v1510_v30  ;;  %v1153_v37 = vsub.f32 %v1031_v11, %v9064_v27 }
  0x84   :  { %309 = vmatmul.mubr.f32.vlgmr.msra.gmra.mxu0 %v8948_v8  ;;  %v190_v61 = vand.u32 4294901760, %v189_v55  ;;  %v196_v62 = vand.u32 4294901760, %v195_v56  ;;  %v658_v32 = vand.u32 4294901760, %v657_v15  ;;  %v1148_v35 = vand.u32 4294901760, %v9058_v25  ;;  %v8798_v55 = vld [vmem:[%s10004_s2 + $0x20] sm:$0xff]  ;;  %v2474_v63 = vpop.permute.xlu1 %2473 }
  0x85   :  { %428 = vmatpush1.msra.mxu0 %v194_v52  ;;  %461 = vmatprep.mubr.f32.mxu0 %v10009_v2  ;;  %v664_v8 = vand.u32 4294901760, %v663_v29  ;;  %v9095_v42 = vand.u32 4294901760, %v1526_v34  ;;  %v2002_v57 = vsel %vm74_vm0, %v8798_v55, 0 }
  0x86   :  { %191 = vmatprep.subr.mxu1 %v190_v61  ;;  %577 = vmatprep.subr.mxu0 %v9006_v41  ;;  %v1149_v43 = vsub.f32 %v9058_v25, %v1148_v35 }
  0x87   :  { %197 = vmatpush1.msra.mxu1 %v196_v62  ;;  %v9111_v51 = vsub.f32 %v1526_v34, %v9095_v42  ;;  %v8799_v62 = vld [vmem:[%s10003_s1 + $0xa] sm:$0x3] }
  0x88   :  { %232 = vmatmul.mubr.f32.vlgmr.msra.gmra.mxu1 %v8945_v6  ;;  %346 = vmatprep.subr.mxu1 %v108_v39  ;;  %v1150_v50 = vand.u32 4294901760, %v1149_v43  ;;  %v9161_v15 = vrot.slane %v8799_v62, %v8957_v13  ;;  %v9187_v31 = vrot.slane %v8799_v62, %v8955_v12 }
  0x89   :  { %463 = vmatmul.mubr.f32.vlgmr.msra.gmra.mxu0 %v8945_v6  ;;  %348 = vmatpush1.msra.mxu1 %v9004_v40  ;;  %v1642_v56 = vand.u32 4294901760, %v9111_v51 }
  0x8a   :  { %579 = vmatpush1.msra.mxu0 %v9016_v48  ;;  %500 = vmatprep.subr.mxu1 %v108_v39  ;;  %v1108_v39 = vsub.f32 %v9054_v20, %v1107_v33  ;;  %10038 = vst [vmem:[#allocation14_spill] sm:$0xff] %v9161_v15  ;;  %10039 = vst [vmem:[#allocation15_spill] sm:$0xff] %v9187_v31 }
  0x8b   :  { %738 = vmatprep.subr.mxu0 %v655_v53  ;;  %381 = vmatprep.mubr.f32.mxu1 %v10009_v2 }
  0x8c   :  { %612 = vmatprep.mubr.f32.mxu0 %v10009_v2  ;;  %385 = vmatmul.mubr.f32.vlgmr.msra.gmra.mxu1 %v147_v17  ;;  %v9082_v17 = vrot.slane %v8796_v14, %v8955_v12  ;;  %v1109_v46 = vand.u32 4294901760, %v1108_v39 }
  0x8d   :  { %502 = vmatpush1.msra.mxu1 %v9004_v40  ;;  %618 = vmatmul.mubr.f32.vlgmr.msra.gmra.mxu0 %v617_v19  ;;  %v9092_v40 = vand.u32 4294901760, %v1530_v36 }
  0x8e   :  { %741 = vmatpush1.msra.mxu0 %v661_v59  ;;  %659 = vmatprep.subr.mxu1 %v658_v32  ;;  %10037 = vst [vmem:[#allocation13_spill] sm:$0xff] %v9082_v17  ;;  %v1525_v45 = vmul.f32 %v9082_v17, %v1511_v38 }
  0x8f   :  { %892 = vmatprep.subr.mxu0 %v656_v3  ;;  %535 = vmatprep.mubr.f32.mxu1 %v10009_v2  ;;  %v9106_v49 = vsub.f32 %v1530_v36, %v9092_v40  ;;  %v2472_v3 = vpop.permute.xlu0 %2471 }
  0x90   :  { %774 = vmatprep.mubr.f32.mxu0 %v10009_v2  ;;  %537 = vmatmul.mubr.f32.vlgmr.msra.gmra.mxu1 %v8945_v6  ;;  %v1154_v6 = vand.u32 4294901760, %v1153_v37  ;;  %v9115_v52 = vand.u32 4294901760, %v1525_v45  ;;  %v2477_v18 = vsel %vm2475_vm5, %v2474_v63, %v2472_v3 }
  0x91   :  { %665 = vmatpush1.msra.mxu1 %v664_v8  ;;  %777 = vmatmul.mubr.f32.vlgmr.msra.gmra.mxu0 %v9010_v44  ;;  %v2968_v8 = vpop.permute.xlu1 %2967 }
  0x92   :  { %896 = vmatpush1.msra.mxu0 %v662_v9  ;;  %814 = vmatprep.subr.mxu1 %v9006_v41  ;;  %v1155_v53 = vsub.f32 %v1153_v37, %v1154_v6  ;;  %v1647_v58 = vsub.f32 %v1525_v45, %v9115_v52  ;;  %v9153_v9 = vand.u32 4294901760, %v8900_v0 }
  0x93   :  { %698 = vmatprep.mubr.f32.mxu1 %v10009_v2  ;;  %929 = vmatprep.mubr.f32.mxu0 %v10009_v2  ;;  %v2966_v38 = vpop.permute.xlu0 %2965 }
  0x94   :  { %700 = vmatmul.mubr.f32.vlgmr.msra.gmra.mxu1 %v8987_v28  ;;  %1069 = vmatprep.subr.mxu0 %v9043_v7  ;;  %v1156_v59 = vand.u32 4294901760, %v1155_v53  ;;  %v1648_v61 = vand.u32 4294901760, %v1647_v58  ;;  %v9181_v29 = vsub.f32 %v8900_v0, %v9153_v9  ;;  %v2476_v0 = vsel %vm2475_vm5, %v2472_v3, %v2474_v63  ;;  %v8803_v3 = vld [vmem:[%s10003_s1 + $0xe] sm:$0x3] }
  0x95   :  { %816 = vmatpush1.msra.mxu1 %v9016_v48  ;;  %931 = vmatmul.mubr.f32.vlgmr.msra.gmra.mxu0 %v8987_v28  ;;  %v2971_v53 = vsel %vm2969_vm6, %v2968_v8, %v2966_v38 }
  0x96   :  { %968 = vmatprep.subr.mxu1 %v9006_v41  ;;  %1071 = vmatpush1.msra.mxu0 %v9064_v27  ;;  %v1601_v41 = vand.u32 4294901760, %v9106_v49  ;;  %v1649_v16 = vsub.f32 %v1647_v58, %v1648_v61 }
  0x97   :  { %1230 = vmatprep.subr.mxu0 %v9058_v25  ;;  %849 = vmatprep.mubr.f32.mxu1 %v10009_v2 }
  0x98   :  { %1104 = vmatprep.mubr.f32.mxu0 %v10009_v2  ;;  %853 = vmatmul.mubr.f32.vlgmr.msra.gmra.mxu1 %v615_v54  ;;  %v1602_v44 = vsub.f32 %v9106_v49, %v1601_v41  ;;  %v1643_v54 = vsub.f32 %v9111_v51, %v1642_v56 }
  0x99   :  { %970 = vmatpush1.msra.mxu1 %v9016_v48  ;;  %1110 = vmatmul.mubr.f32.vlgmr.msra.gmra.mxu0 %v1109_v46  ;;  %v9135_v48 = vand.u32 4294901760, %v2002_v57 }
  0x9a   :  { %1233 = vmatpush1.msra.mxu0 %v1153_v37  ;;  %1151 = vmatprep.subr.mxu1 %v1150_v50  ;;  %v1603_v4 = vand.u32 4294901760, %v1602_v44  ;;  %v1644_v14 = vand.u32 4294901760, %v1643_v54  ;;  %v8801_v37 = vld [vmem:[%s10003_s1 + $0xc] sm:$0x3] }
  0x9b   :  { %1384 = vmatprep.subr.mxu0 %v1148_v35  ;;  %1003 = vmatprep.mubr.f32.mxu1 %v10009_v2  ;;  %v9156_v11 = vsub.f32 %v2002_v57, %v9135_v48  ;;  %v9226_v46 = vrot.slane %v8801_v37, %v8957_v13 }
  0x9c   :  { %1266 = vmatprep.mubr.f32.mxu0 %v10009_v2  ;;  %1005 = vmatmul.mubr.f32.vlgmr.msra.gmra.mxu1 %v8987_v28  ;;  %v9142_v28 = vand.u32 4294901760, %v8909_v1 }
  0x9d   :  { %1157 = vmatpush1.msra.mxu1 %v1156_v59  ;;  %1269 = vmatmul.mubr.f32.vlgmr.msra.gmra.mxu0 %v9054_v20  ;;  %v2073_v25 = vand.u32 4294901760, %v9156_v11  ;;  %v1650_v20 = vand.u32 4294901760, %v1649_v16  ;;  %10040 = vst [vmem:[#allocation16_spill] sm:$0xff] %v9226_v46  ;;  %v2986_v57 = vmul.f32 %v9226_v46, %v2971_v53 }
  0x9e   :  { %1388 = vmatpush1.msra.mxu0 %v1154_v6  ;;  %1306 = vmatprep.subr.mxu1 %v9043_v7  ;;  %v9169_v19 = vsub.f32 %v8909_v1, %v9142_v28  ;;  %v2492_v1 = vmul.f32 %v9161_v15, %v2477_v18 }
  0x9f   :  { %1190 = vmatprep.mubr.f32.mxu1 %v10009_v2  ;;  %1421 = vmatprep.mubr.f32.mxu0 %v10009_v2  ;;  %v2074_v32 = vsub.f32 %v9156_v11, %v2073_v25 }
  0xa0   :  { %1192 = vmatmul.mubr.f32.vlgmr.msra.gmra.mxu1 %v9040_v5  ;;  %1563 = vmatprep.subr.mxu0 %v9095_v42  ;;  %v9202_v35 = vand.u32 4294901760, %v2492_v1 }
  0xa1   :  { %1308 = vmatpush1.msra.mxu1 %v9064_v27  ;;  %1423 = vmatmul.mubr.f32.vlgmr.msra.gmra.mxu0 %v9040_v5  ;;  %v2075_v39 = vand.u32 4294901760, %v2074_v32 }
  0xa2   :  { %1460 = vmatprep.subr.mxu1 %v9043_v7  ;;  %1565 = vmatpush1.msra.mxu0 %v9115_v52  ;;  %v8800_v7 = vld [vmem:[%s10004_s2 + $0x28] sm:$0xff]  ;;  %v9223_v45 = vsub.f32 %v2492_v1, %v9202_v35 }
  0xa3   :  { %1724 = vmatprep.subr.mxu0 %v9111_v51  ;;  %1341 = vmatprep.mubr.f32.mxu1 %v10009_v2  ;;  %v2496_v30 = vsel %vm74_vm0, %v8800_v7, 0 }
  0xa4   :  { %1598 = vmatprep.mubr.f32.mxu0 %v10009_v2  ;;  %1345 = vmatmul.mubr.f32.vlgmr.msra.gmra.mxu1 %v1107_v33  ;;  %v2120_v33 = vand.u32 4294901760, %v9181_v29  ;;  %v9199_v34 = vand.u32 4294901760, %v2496_v30 }
  0xa5   :  { %1462 = vmatpush1.msra.mxu1 %v9064_v27  ;;  %1604 = vmatmul.mubr.f32.vlgmr.msra.gmra.mxu0 %v1603_v4  ;;  %v2114_v27 = vand.u32 4294901760, %v9169_v19  ;;  %v3462_v4 = vpop.permute.xlu1 %3461 }
  0xa6   :  { %1727 = vmatpush1.msra.mxu0 %v1647_v58  ;;  %1645 = vmatprep.subr.mxu1 %v1644_v14  ;;  %v2121_v43 = vsub.f32 %v9181_v29, %v2120_v33  ;;  %v9218_v6 = vsub.f32 %v2496_v30, %v9199_v34  ;;  %v2608_v58 = vand.u32 4294901760, %v9223_v45  ;;  %v3460_v14 = vpop.permute.xlu0 %3459 }
  0xa7   :  { %1878 = vmatprep.subr.mxu0 %v1642_v56  ;;  %1495 = vmatprep.mubr.f32.mxu1 %v10009_v2  ;;  %v2115_v36 = vsub.f32 %v9169_v19, %v2114_v27 }
  0xa8   :  { %1760 = vmatprep.mubr.f32.mxu0 %v10009_v2  ;;  %1497 = vmatmul.mubr.f32.vlgmr.msra.gmra.mxu1 %v9040_v5  ;;  %v2491_v5 = vmul.f32 %v9187_v31, %v2476_v0  ;;  %v2122_v55 = vand.u32 4294901760, %v2121_v43  ;;  %v2567_v56 = vand.u32 4294901760, %v9218_v6  ;;  %v8805_v43 = vld [vmem:[%s10003_s1 + $0x10] sm:$0x3] }
  0xa9   :  { %1651 = vmatpush1.msra.mxu1 %v1650_v20  ;;  %1763 = vmatmul.mubr.f32.vlgmr.msra.gmra.mxu0 %v9106_v49  ;;  %v2116_v51 = vand.u32 4294901760, %v2115_v36  ;;  %v3465_v20 = vsel %vm3463_vm7, %v3462_v4, %v3460_v14 }
  0xaa   :  { %1882 = vmatpush1.msra.mxu0 %v1648_v61  ;;  %1800 = vmatprep.subr.mxu1 %v9095_v42  ;;  %v9230_v50 = vand.u32 4294901760, %v2491_v5  ;;  %v2568_v44 = vsub.f32 %v9218_v6, %v2567_v56  ;;  %v9262_v61 = vand.u32 4294901760, %v2986_v57 }
  0xab   :  { %1684 = vmatprep.mubr.f32.mxu1 %v10009_v2  ;;  %1915 = vmatprep.mubr.f32.mxu0 %v10009_v2 }
  0xac   :  { %1686 = vmatmul.mubr.f32.vlgmr.msra.gmra.mxu1 %v9092_v40  ;;  %2035 = vmatprep.subr.mxu0 %v9142_v28  ;;  %v2613_v49 = vsub.f32 %v2491_v5, %v9230_v50  ;;  %v2569_v16 = vand.u32 4294901760, %v2568_v44  ;;  %v9282_v7 = vsub.f32 %v2986_v57, %v9262_v61 }
  0xad   :  { %1802 = vmatpush1.msra.mxu1 %v9115_v52  ;;  %1917 = vmatmul.mubr.f32.vlgmr.msra.gmra.mxu0 %v9092_v40 }
  0xae   :  { %1954 = vmatprep.subr.mxu1 %v9095_v42  ;;  %1835 = vmatprep.mubr.f32.mxu1 %v10009_v2  ;;  %v8802_v42 = vld [vmem:[%s10004_s2 + $0x30] sm:$0xff]  ;;  %v2614_v62 = vand.u32 4294901760, %v2613_v49 }
  0xaf   :  { %2037 = vmatpush1.msra.mxu0 %v9153_v9  ;;  %2070 = vmatprep.mubr.f32.mxu0 %v10009_v2  ;;  %v2990_v59 = vsel %vm74_vm0, %v8802_v42, 0 }
  0xb0   :  { %1839 = vmatmul.mubr.f32.vlgmr.msra.gmra.mxu1 %v1601_v41  ;;  %2196 = vmatprep.subr.mxu0 %v9169_v19  ;;  %v2970_v41 = vsel %vm2969_vm6, %v2966_v38, %v2968_v8  ;;  %v9259_v54 = vand.u32 4294901760, %v2990_v59  ;;  %v2615_v30 = vsub.f32 %v2613_v49, %v2614_v62 }
  0xb1   :  { %1956 = vmatpush1.msra.mxu1 %v9115_v52  ;;  %2076 = vmatmul.mubr.f32.vlgmr.msra.gmra.mxu0 %v2075_v39  ;;  %v9250_v52 = vrot.slane %v8801_v37, %v8955_v12 }
  0xb2   :  { %1989 = vmatprep.mubr.f32.mxu1 %v10009_v2  ;;  %2199 = vmatpush1.msra.mxu0 %v9181_v29  ;;  %v9277_v18 = vsub.f32 %v2990_v59, %v9259_v54  ;;  %v9285_v29 = vrot.slane %v8803_v3, %v8957_v13 }
  0xb3   :  { %2232 = vmatprep.mubr.f32.mxu0 %v10009_v2  ;;  %2117 = vmatprep.subr.mxu1 %v2116_v51  ;;  %10041 = vst [vmem:[#allocation17_spill] sm:$0xff] %v9250_v52  ;;  %v2985_v63 = vmul.f32 %v9250_v52, %v2970_v41  ;;  %v3954_v51 = vpop.permute.xlu0 %3953 }
  0xb4   :  { %1991 = vmatmul.mubr.f32.vlgmr.msra.gmra.mxu1 %v9092_v40  ;;  %2350 = vmatprep.subr.mxu0 %v2114_v27  ;;  %v2609_v40 = vsub.f32 %v9223_v45, %v2608_v58  ;;  %10042 = vst [vmem:[#allocation18_spill] sm:$0xff] %v9285_v29  ;;  %v8804_v27 = vld [vmem:[%s10004_s2 + $0x38] sm:$0xff]  ;;  %v3061_v0 = vand.u32 4294901760, %v9277_v18  ;;  %v3480_v32 = vmul.f32 %v9285_v29, %v3465_v20 }
  0xb5   :  { %2235 = vmatmul.mubr.f32.vlgmr.msra.gmra.mxu0 %v9156_v11  ;;  %2123 = vmatpush1.msra.mxu1 %v2122_v55  ;;  %v9289_v1 = vand.u32 4294901760, %v2985_v63  ;;  %v3484_v5 = vsel %vm74_vm0, %v8804_v27, 0  ;;  %v9309_v11 = vrot.slane %v8803_v3, %v8955_v12 }
  0xb6   :  { %2156 = vmatprep.mubr.f32.mxu1 %v10009_v2  ;;  %2354 = vmatpush1.msra.mxu0 %v2120_v33  ;;  %v2610_v19 = vand.u32 4294901760, %v2609_v40  ;;  %v3102_v33 = vand.u32 4294901760, %v9282_v7  ;;  %v9319_v37 = vand.u32 4294901760, %v3484_v5  ;;  %v9322_v8 = vand.u32 4294901760, %v3480_v32 }
  0xb7   :  { %2387 = vmatprep.mubr.f32.mxu0 %v10009_v2  ;;  %2529 = vmatprep.subr.mxu0 %v9202_v35  ;;  %v9305_v36 = vsub.f32 %v2985_v63, %v9289_v1  ;;  %10043 = vst [vmem:[#allocation19_spill] sm:$0xff] %v9309_v11 }
  0xb8   :  { %2158 = vmatmul.mubr.f32.vlgmr.msra.gmra.mxu1 %v9135_v48  ;;  %2272 = vmatprep.subr.mxu1 %v9142_v28  ;;  %v3103_v38 = vsub.f32 %v9282_v7, %v3102_v33  ;;  %v9338_v42 = vsub.f32 %v3484_v5, %v9319_v37  ;;  %v3595_v57 = vsub.f32 %v3480_v32, %v9322_v8 }
  0xb9   :  { %2389 = vmatmul.mubr.f32.vlgmr.msra.gmra.mxu0 %v9135_v48  ;;  %2274 = vmatpush1.msra.mxu1 %v9153_v9 }
  0xba   :  { %2531 = vmatpush1.msra.mxu0 %v9230_v50  ;;  %2307 = vmatprep.mubr.f32.mxu1 %v10009_v2  ;;  %v3104_v55 = vand.u32 4294901760, %v3103_v38  ;;  %v3596_v40 = vand.u32 4294901760, %v3595_v57 }
  0xbb   :  { %2690 = vmatprep.subr.mxu0 %v9223_v45  ;;  %2564 = vmatprep.mubr.f32.mxu0 %v10009_v2  ;;  %v3956_v45 = vpop.permute.xlu1 %3955 }
  0xbc   :  { %2311 = vmatmul.mubr.f32.vlgmr.msra.gmra.mxu1 %v2073_v25  ;;  %2426 = vmatprep.subr.mxu1 %v9142_v28  ;;  %v2616_v28 = vand.u32 4294901760, %v2615_v30  ;;  %v3062_v25 = vsub.f32 %v9277_v18, %v3061_v0  ;;  %v3959_v41 = vsel %vm3957_vm8, %v3956_v45, %v3954_v51 }
  0xbd   :  { %2570 = vmatmul.mubr.f32.vlgmr.msra.gmra.mxu0 %v2569_v16  ;;  %2428 = vmatpush1.msra.mxu1 %v9153_v9  ;;  %v3464_v9 = vsel %vm3463_vm7, %v3460_v14, %v3462_v4  ;;  %v3597_v14 = vsub.f32 %v3595_v57, %v3596_v40 }
  0xbe   :  { %2693 = vmatpush1.msra.mxu0 %v2613_v49  ;;  %2611 = vmatprep.subr.mxu1 %v2610_v19  ;;  %v3479_v39 = vmul.f32 %v9309_v11, %v3464_v9  ;;  %v3063_v53 = vand.u32 4294901760, %v3062_v25 }
  0xbf   :  { %2844 = vmatprep.subr.mxu0 %v2608_v58  ;;  %2461 = vmatprep.mubr.f32.mxu1 %v10009_v2  ;;  %v9344_v58 = vrot.slane %v8805_v43, %v8957_v13  ;;  %v3555_v13 = vand.u32 4294901760, %v9338_v42  ;;  %v3598_v30 = vand.u32 4294901760, %v3597_v14 }
  0xc0   :  { %2726 = vmatprep.mubr.f32.mxu0 %v10009_v2  ;;  %2463 = vmatmul.mubr.f32.vlgmr.msra.gmra.mxu1 %v9135_v48  ;;  %v3108_v48 = vand.u32 4294901760, %v9305_v36  ;;  %v9348_v59 = vand.u32 4294901760, %v3479_v39 }
  0xc1   :  { %2617 = vmatpush1.msra.mxu1 %v2616_v28  ;;  %2729 = vmatmul.mubr.f32.vlgmr.msra.gmra.mxu0 %v9218_v6  ;;  %10044 = vst [vmem:[#allocation20_spill] sm:$0xff] %v9344_v58  ;;  %v3974_v44 = vmul.f32 %v9344_v58, %v3959_v41  ;;  %v3556_v3 = vsub.f32 %v9338_v42, %v3555_v13 }
  0xc2   :  { %2848 = vmatpush1.msra.mxu0 %v2614_v62  ;;  %2766 = vmatprep.subr.mxu1 %v9202_v35  ;;  %v3109_v49 = vsub.f32 %v9305_v36, %v3108_v48  ;;  %v3601_v63 = vsub.f32 %v3479_v39, %v9348_v59 }
  0xc3   :  { %2650 = vmatprep.mubr.f32.mxu1 %v10009_v2  ;;  %2881 = vmatprep.mubr.f32.mxu0 %v10009_v2  ;;  %v3557_v19 = vand.u32 4294901760, %v3556_v3 }
  0xc4   :  { %2652 = vmatmul.mubr.f32.vlgmr.msra.gmra.mxu1 %v9199_v34  ;;  %3023 = vmatprep.subr.mxu0 %v9262_v61  ;;  %v3110_v6 = vand.u32 4294901760, %v3109_v49  ;;  %v3602_v16 = vand.u32 4294901760, %v3601_v63 }
  0xc5   :  { %2768 = vmatpush1.msra.mxu1 %v9230_v50  ;;  %2883 = vmatmul.mubr.f32.vlgmr.msra.gmra.mxu0 %v9199_v34 }
  0xc6   :  { %2920 = vmatprep.subr.mxu1 %v9202_v35  ;;  %3025 = vmatpush1.msra.mxu0 %v9289_v1  ;;  %v8806_v35 = vld [vmem:[%s10004_s2 + $0x40] sm:$0xff]  ;;  %v3603_v32 = vsub.f32 %v3601_v63, %v3602_v16 }
  0xc7   :  { %3184 = vmatprep.subr.mxu0 %v9282_v7  ;;  %2801 = vmatprep.mubr.f32.mxu1 %v10009_v2  ;;  %v3978_v62 = vsel %vm74_vm0, %v8806_v35, 0 }
  0xc8   :  { %3058 = vmatprep.mubr.f32.mxu0 %v10009_v2  ;;  %2805 = vmatmul.mubr.f32.vlgmr.msra.gmra.mxu1 %v2567_v56  ;;  %v9367_v56 = vrot.slane %v8805_v43, %v8955_v12  ;;  %v9377_v4 = vand.u32 4294901760, %v3978_v62  ;;  %v9380_v12 = vand.u32 4294901760, %v3974_v44 }
  0xc9   :  { %2922 = vmatpush1.msra.mxu1 %v9230_v50  ;;  %3064 = vmatmul.mubr.f32.vlgmr.msra.gmra.mxu0 %v3063_v53  ;;  %v3958_v50 = vsel %vm3957_vm8, %v3954_v51, %v3956_v45 }
  0xca   :  { %3187 = vmatpush1.msra.mxu0 %v9305_v36  ;;  %3105 = vmatprep.subr.mxu1 %v3104_v55  ;;  %10045 = vst [vmem:[#allocation21_spill] sm:$0xff] %v9367_v56  ;;  %v9390_v7 = vsub.f32 %v3978_v62, %v9377_v4  ;;  %v4089_v20 = vsub.f32 %v3974_v44, %v9380_v12  ;;  %v3604_v36 = vand.u32 4294901760, %v3603_v32 }
  0xcb   :  { %3338 = vmatprep.subr.mxu0 %v3102_v33  ;;  %2955 = vmatprep.mubr.f32.mxu1 %v10009_v2 }
  0xcc   :  { %3220 = vmatprep.mubr.f32.mxu0 %v10009_v2  ;;  %2957 = vmatmul.mubr.f32.vlgmr.msra.gmra.mxu1 %v9199_v34  ;;  %v3973_v34 = vmul.f32 %v9367_v56, %v3958_v50  ;;  %v4090_v33 = vand.u32 4294901760, %v4089_v20 }
  0xcd   :  { %3111 = vmatpush1.msra.mxu1 %v3110_v6  ;;  %3223 = vmatmul.mubr.f32.vlgmr.msra.gmra.mxu0 %v9277_v18 }
  0xce   :  { %3342 = vmatpush1.msra.mxu0 %v3108_v48  ;;  %3260 = vmatprep.subr.mxu1 %v9262_v61  ;;  %v4012_v27 = vand.u32 4294901760, %v3973_v34 }
  0xcf   :  { %3144 = vmatprep.mubr.f32.mxu1 %v10009_v2  ;;  %3375 = vmatprep.mubr.f32.mxu0 %v10009_v2 }
  0xd0   :  { %3146 = vmatmul.mubr.f32.vlgmr.msra.gmra.mxu1 %v9259_v54  ;;  %3517 = vmatprep.subr.mxu0 %v9322_v8  ;;  %v4095_v5 = vsub.f32 %v3973_v34, %v4012_v27 }
  0xd1   :  { %3262 = vmatpush1.msra.mxu1 %v9289_v1  ;;  %3377 = vmatmul.mubr.f32.vlgmr.msra.gmra.mxu0 %v9259_v54 }
  0xd2   :  { %3414 = vmatprep.subr.mxu1 %v9262_v61  ;;  %3519 = vmatpush1.msra.mxu0 %v9348_v59  ;;  %v4049_v61 = vand.u32 4294901760, %v9390_v7 }
  0xd3   :  { %3678 = vmatprep.subr.mxu0 %v3595_v57  ;;  %3295 = vmatprep.mubr.f32.mxu1 %v10009_v2 }
  0xd4   :  { %3552 = vmatprep.mubr.f32.mxu0 %v10009_v2  ;;  %3299 = vmatmul.mubr.f32.vlgmr.msra.gmra.mxu1 %v3061_v0  ;;  %v4050_v18 = vsub.f32 %v9390_v7, %v4049_v61  ;;  %v4096_v0 = vand.u32 4294901760, %v4095_v5 }
  0xd5   :  { %3416 = vmatpush1.msra.mxu1 %v9289_v1  ;;  %3558 = vmatmul.mubr.f32.vlgmr.msra.gmra.mxu0 %v3557_v19  ;;  %v4091_v1 = vsub.f32 %v4089_v20, %v4090_v33 }
  0xd6   :  { %3681 = vmatpush1.msra.mxu0 %v3601_v63  ;;  %3599 = vmatprep.subr.mxu1 %v3598_v30  ;;  %v4097_v9 = vsub.f32 %v4095_v5, %v4096_v0 }
  0xd7   :  { %3832 = vmatprep.subr.mxu0 %v3596_v40  ;;  %3449 = vmatprep.mubr.f32.mxu1 %v10009_v2  ;;  %v4092_v28 = vand.u32 4294901760, %v4091_v1 }
  0xd8   :  { %3714 = vmatprep.mubr.f32.mxu0 %v10009_v2  ;;  %3451 = vmatmul.mubr.f32.vlgmr.msra.gmra.mxu1 %v9259_v54  ;;  %v4051_v54 = vand.u32 4294901760, %v4050_v18  ;;  %v4098_v25 = vand.u32 4294901760, %v4097_v9 }
  0xd9   :  { %3605 = vmatpush1.msra.mxu1 %v3604_v36  ;;  %3717 = vmatmul.mubr.f32.vlgmr.msra.gmra.mxu0 %v9338_v42 }
  0xda   :  { %3836 = vmatpush1.msra.mxu0 %v3602_v16  ;;  %3754 = vmatprep.subr.mxu1 %v9322_v8 }
  0xdb   :  { %3638 = vmatprep.mubr.f32.mxu1 %v10009_v2  ;;  %3869 = vmatprep.mubr.f32.mxu0 %v10009_v2 }
  0xdc   :  { %3640 = vmatmul.mubr.f32.vlgmr.msra.gmra.mxu1 %v9319_v37  ;;  %4011 = vmatprep.subr.mxu0 %v9380_v12 }
  0xdd   :  { %3756 = vmatpush1.msra.mxu1 %v9348_v59  ;;  %3871 = vmatmul.mubr.f32.vlgmr.msra.gmra.mxu0 %v9319_v37 }
  0xde   :  { %3908 = vmatprep.subr.mxu1 %v9322_v8  ;;  %4013 = vmatpush1.msra.mxu0 %v4012_v27 }
  0xdf   :  { %4172 = vmatprep.subr.mxu0 %v4089_v20  ;;  %3789 = vmatprep.mubr.f32.mxu1 %v10009_v2 }
  0xe0   :  { %4046 = vmatprep.mubr.f32.mxu0 %v10009_v2  ;;  %3793 = vmatmul.mubr.f32.vlgmr.msra.gmra.mxu1 %v3555_v13 }
  0xe1   :  { %3910 = vmatpush1.msra.mxu1 %v9348_v59  ;;  %4052 = vmatmul.mubr.f32.vlgmr.msra.gmra.mxu0 %v4051_v54 }
  0xe2   :  { %4175 = vmatpush1.msra.mxu0 %v4095_v5  ;;  %4093 = vmatprep.subr.mxu1 %v4092_v28 }
  0xe3   :  { %4326 = vmatprep.subr.mxu0 %v4090_v33  ;;  %3943 = vmatprep.mubr.f32.mxu1 %v10009_v2 }
  0xe4   :  { %4208 = vmatprep.mubr.f32.mxu0 %v10009_v2  ;;  %3945 = vmatmul.mubr.f32.vlgmr.msra.gmra.mxu1 %v9319_v37 }
  0xe5   :  { %4099 = vmatpush1.msra.mxu1 %v4098_v25  ;;  %4211 = vmatmul.mubr.f32.vlgmr.msra.gmra.mxu0 %v9390_v7 }
  0xe6   :  { %4330 = vmatpush1.msra.mxu0 %v4096_v0  ;;  %4248 = vmatprep.subr.mxu1 %v9380_v12 }
  0xe7   :  { %4132 = vmatprep.mubr.f32.mxu1 %v10009_v2  ;;  %4363 = vmatprep.mubr.f32.mxu0 %v10009_v2 }
  0xe8   :  { %4134 = vmatmul.mubr.f32.vlgmr.msra.gmra.mxu1 %v9377_v4 }
  0xe9   :  { %4250 = vmatpush1.msra.mxu1 %v4012_v27  ;;  %4283 = vmatprep.mubr.f32.mxu1 %v10009_v2 }
  0xea   :  { %4402 = vmatprep.subr.mxu1 %v9380_v12  ;;  %4365 = vmatmul.mubr.f32.vlgmr.msra.gmra.mxu0 %v9377_v4 }
  0xeb   :  { %4545 = vmatprep.mubr.f32.mxu0 %v10009_v2 }
  0xec   :  { %4287 = vmatmul.mubr.f32.vlgmr.msra.gmra.mxu1 %v4049_v61 }
  0xed   :  { %4404 = vmatpush1.msra.mxu1 %v4012_v27  ;;  %4437 = vmatprep.mubr.f32.mxu1 %v10009_v2 }
  0xf0   :  { %4439 = vmatmul.mubr.f32.vlgmr.msra.gmra.mxu1 %v9377_v4 }
  0xf1   :  { %4631 = vmatprep.mubr.f32.mxu1 %v10009_v2 }
 0x140   :  { %v151_v37 = vpop.f32.mrf.mxu0 }
 0x142   :  { %v153_v8 = vpop.f32.mrf.mxu0 }
 0x144   :  { %v310_v38 = vpop.f32.mrf.mxu0 }
 0x146   :  { %v312_v48 = vpop.f32.mrf.mxu0 }
 0x148   :  { %v233_v39 = vpop.f32.mrf.mxu1 }
 0x149   :  { %v234_v43 = vadd.f32 %v233_v39, %v151_v37  ;;  %v464_v45 = vpop.f32.mrf.mxu0 }
 0x14a   :  { %v235_v51 = vpop.f32.mrf.mxu1 }
 0x14b   :  { %v311_v53 = vadd.f32 %v310_v38, %v234_v43  ;;  %v236_v42 = vadd.f32 %v235_v51, %v153_v8  ;;  %v466_v55 = vpop.f32.mrf.mxu0 }
 0x14c   :  { %v386_v57 = vpop.f32.mrf.mxu1 }
 0x14d   :  { %v313_v59 = vadd.f32 %v312_v48, %v236_v42  ;;  %v387_v49 = vadd.f32 %v386_v57, %v311_v53  ;;  %v619_v41 = vpop.f32.mrf.mxu0 }
 0x14e   :  { %v388_v35 = vpop.f32.mrf.mxu1 }
 0x14f   :  { %v465_v13 = vadd.f32 %v464_v45, %v387_v49  ;;  %v389_v44 = vadd.f32 %v388_v35, %v313_v59  ;;  %v621_v40 = vpop.f32.mrf.mxu0 }
 0x150   :  { %v538_v62 = vpop.f32.mrf.mxu1 }
 0x151   :  { %v467_v63 = vadd.f32 %v466_v55, %v389_v44  ;;  %v539_v6 = vadd.f32 %v538_v62, %v465_v13  ;;  %v778_v50 = vpop.f32.mrf.mxu0 }
 0x152   :  { %v540_v3 = vpop.f32.mrf.mxu1 }
 0x153   :  { %v620_v4 = vadd.f32 %v619_v41, %v539_v6  ;;  %v541_v12 = vadd.f32 %v540_v3, %v467_v63  ;;  %v780_v14 = vpop.f32.mrf.mxu0 }
 0x154   :  { %v701_v16 = vpop.f32.mrf.mxu1 }
 0x155   :  { %v622_v34 = vadd.f32 %v621_v40, %v541_v12  ;;  %v702_v19 = vadd.f32 %v701_v16, %v620_v4  ;;  %v932_v7 = vpop.f32.mrf.mxu0 }
 0x156   :  { %v703_v30 = vpop.f32.mrf.mxu1 }
 0x157   :  { %v779_v20 = vadd.f32 %v778_v50, %v702_v19  ;;  %v704_v27 = vadd.f32 %v703_v30, %v622_v34  ;;  %v934_v32 = vpop.f32.mrf.mxu0 }
 0x158   :  { %v854_v61 = vpop.f32.mrf.mxu1 }
 0x159   :  { %v781_v33 = vadd.f32 %v780_v14, %v704_v27  ;;  %v855_v5 = vadd.f32 %v854_v61, %v779_v20  ;;  %v9434_v36 = vpop.f32.mrf.mxu0 }
 0x15a   :  { %v856_v18 = vpop.f32.mrf.mxu1 }
 0x15b   :  { %v933_v1 = vadd.f32 %v932_v7, %v855_v5  ;;  %v857_v0 = vadd.f32 %v856_v18, %v781_v33  ;;  %v1113_v54 = vpop.f32.mrf.mxu0 }
 0x15c   :  { %v1006_v28 = vpop.f32.mrf.mxu1 }
 0x15d   :  { %v935_v9 = vadd.f32 %v934_v32, %v857_v0  ;;  %v9436_v25 = vadd.f32 %v1006_v28, %v933_v1  ;;  %v9438_v37 = vpop.f32.mrf.mxu0 }
 0x15e   :  { %v1008_v8 = vpop.f32.mrf.mxu1 }
 0x15f   :  { %v1009_v38 = vadd.f32 %v1008_v8, %v935_v9  ;;  %v1272_v48 = vpop.f32.mrf.mxu0 }
 0x160   :  { %v1193_v39 = vpop.f32.mrf.mxu1 }
 0x161   :  { %v9440_v43 = vpop.f32.mrf.mxu0  ;;  %v1194_v29 = vadd.f32 %v1193_v39, %v9434_v36 }
 0x162   :  { %v1195_v45 = vpop.f32.mrf.mxu1 }
 0x163   :  { %v1196_v51 = vadd.f32 %v1195_v45, %v1113_v54  ;;  %v1426_v53 = vpop.f32.mrf.mxu0  ;;  %v1271_v26 = vadd.f32 %v9438_v37, %v1194_v29 }
 0x164   :  { %v9442_v42 = vpop.f32.mrf.mxu1 }
 0x165   :  { %v1273_v55 = vadd.f32 %v1272_v48, %v1196_v51  ;;  %v1605_v57 = vpop.f32.mrf.mxu0  ;;  %v1347_v36 = vadd.f32 %v9442_v42, %v1271_v26 }
 0x166   :  { %v1348_v59 = vpop.f32.mrf.mxu1 }
 0x167   :  { %v1349_v49 = vadd.f32 %v1348_v59, %v1273_v55  ;;  %v1607_v41 = vpop.f32.mrf.mxu0 }
 0x168   :  { %v9444_v35 = vpop.f32.mrf.mxu1 }
 0x169   :  { %v1427_v13 = vadd.f32 %v1426_v53, %v1349_v49  ;;  %v1764_v44 = vpop.f32.mrf.mxu0 }
 0x16a   :  { %v1500_v40 = vpop.f32.mrf.mxu1 }
 0x16b   :  { %v1501_v62 = vadd.f32 %v1500_v40, %v1427_v13  ;;  %v1766_v63 = vpop.f32.mrf.mxu0 }
 0x16c   :  { %v1687_v6 = vpop.f32.mrf.mxu1 }
 0x16d   :  { %v9446_v50 = vadd.f32 %v1501_v62, %v1009_v38  ;;  %v9448_v3 = vpop.f32.mrf.mxu0  ;;  %v1688_v31 = vadd.f32 %v1687_v6, %v1605_v57 }
 0x16e   :  { %v1689_v4 = vpop.f32.mrf.mxu1 }
 0x16f   :  { %10046 = vst [vmem:[#allocation22_spill] sm:$0xff] %v9446_v50  ;;  %v9450_v12 = vpop.f32.mrf.mxu0  ;;  %v1690_v60 = vadd.f32 %v1689_v4, %v1607_v41  ;;  %v1765_v22 = vadd.f32 %v1764_v44, %v1688_v31 }
 0x170   :  { %v1840_v14 = vpop.f32.mrf.mxu1 }
 0x171   :  { %v2077_v16 = vpop.f32.mrf.mxu0  ;;  %v1767_v39 = vadd.f32 %v1766_v63, %v1690_v60  ;;  %v1841_v29 = vadd.f32 %v1840_v14, %v1765_v22 }
 0x172   :  { %v9452_v34 = vpop.f32.mrf.mxu1 }
 0x173   :  { %v2079_v19 = vpop.f32.mrf.mxu0 }
 0x174   :  { %v9454_v7 = vpop.f32.mrf.mxu1 }
 0x175   :  { %v2236_v30 = vpop.f32.mrf.mxu0 }
 0x176   :  { %v9456_v20 = vpop.f32.mrf.mxu1 }
 0x177   :  { %v2238_v27 = vpop.f32.mrf.mxu0 }
 0x178   :  { %v2159_v32 = vpop.f32.mrf.mxu1 }
 0x179   :  { %v9458_v61 = vpop.f32.mrf.mxu0  ;;  %v2160_v47 = vadd.f32 %v2159_v32, %v2077_v16  ;;  %v1843_v32 = vadd.f32 %v9452_v34, %v1767_v39 }
 0x17a   :  { %v2161_v33 = vpop.f32.mrf.mxu1 }
 0x17b   :  { %v9460_v5 = vpop.f32.mrf.mxu0  ;;  %v2162_v21 = vadd.f32 %v2161_v33, %v2079_v19  ;;  %v1425_v19 = vadd.f32 %v9440_v43, %v1347_v36  ;;  %v1921_v43 = vadd.f32 %v9450_v12, %v1843_v32 }
 0x17c   :  { %v2312_v18 = vpop.f32.mrf.mxu1 }
 0x17d   :  { %v2571_v1 = vpop.f32.mrf.mxu0  ;;  %v2239_v37 = vadd.f32 %v2238_v27, %v2162_v21  ;;  %v1995_v12 = vadd.f32 %v9456_v20, %v1921_v43  ;;  %v10054_v20 = vld [vmem:[#allocation22_spill] sm:$0xff]  ;;  %v4451_v43 = vpop.permute.xlu0 %4450 }
 0x17e   :  { %v2314_v0 = vpop.f32.mrf.mxu1 }
 0x17f   :  { %v2573_v54 = vpop.f32.mrf.mxu0  ;;  %v1998_v36 = vadd.f32 %v1995_v12, %v10054_v20 }
 0x180   :  { %v9462_v28 = vpop.f32.mrf.mxu1 }
 0x181   :  { %v2730_v9 = vpop.f32.mrf.mxu0 }
 0x182   :  { %v9464_v8 = vpop.f32.mrf.mxu1 }
 0x183   :  { %10047 = vst [vmem:[#allocation23_spill] sm:$0xff] %v9464_v8  ;;  %v2732_v38 = vpop.f32.mrf.mxu0 }
 0x184   :  { %v2653_v48 = vpop.f32.mrf.mxu1 }
 0x185   :  { %v9466_v45 = vpop.f32.mrf.mxu0  ;;  %v2654_v10 = vadd.f32 %v2653_v48, %v2571_v1 }
 0x186   :  { %v2655_v51 = vpop.f32.mrf.mxu1 }
 0x187   :  { %v9468_v53 = vpop.f32.mrf.mxu0  ;;  %v2731_v41 = vadd.f32 %v2730_v9, %v2654_v10 }
 0x188   :  { %v2806_v55 = vpop.f32.mrf.mxu1 }
 0x189   :  { %v3065_v59 = vpop.f32.mrf.mxu0  ;;  %v2807_v22 = vadd.f32 %v2806_v55, %v2731_v41 }
 0x18a   :  { %v2808_v49 = vpop.f32.mrf.mxu1 }
 0x18b   :  { %v3067_v13 = vpop.f32.mrf.mxu0 }
 0x18c   :  { %v9470_v40 = vpop.f32.mrf.mxu1 }
 0x18d   :  { %10048 = vst [vmem:[#allocation24_spill] sm:$0xff] %v9470_v40  ;;  %v3224_v62 = vpop.f32.mrf.mxu0  ;;  %v2237_v40 = vadd.f32 %v2236_v30, %v2160_v47  ;;  %v2315_v30 = vadd.f32 %v2314_v0, %v2239_v37  ;;  %v2885_v0 = vadd.f32 %v9466_v45, %v2807_v22 }
 0x18e   :  { %v9472_v2 = vpop.f32.mrf.mxu1 }
 0x18f   :  { %10049 = vst [vmem:[#allocation25_spill] sm:$0xff] %v9472_v2  ;;  %v3226_v56 = vpop.f32.mrf.mxu0  ;;  %v2313_v33 = vadd.f32 %v2312_v18, %v2237_v40 }
 0x190   :  { %v3147_v58 = vpop.f32.mrf.mxu1 }
 0x191   :  { %v9474_v11 = vpop.f32.mrf.mxu0  ;;  %v3148_v6 = vadd.f32 %v3147_v58, %v3065_v59  ;;  %v1919_v58 = vadd.f32 %v9448_v3, %v1841_v29  ;;  %v2391_v34 = vadd.f32 %v9458_v61, %v2313_v33  ;;  %v2393_v3 = vadd.f32 %v9460_v5, %v2315_v30  ;;  %v10051_v5 = vld [vmem:[#allocation23_spill] sm:$0xff] }
 0x192   :  { %v3149_v52 = vpop.f32.mrf.mxu1 }
 0x193   :  { %v9477_v46 = vpop.f32.mrf.mxu0  ;;  %v3150_v16 = vadd.f32 %v3149_v52, %v3067_v13  ;;  %v3225_v47 = vadd.f32 %v3224_v62, %v3148_v6  ;;  %v2465_v61 = vadd.f32 %v9462_v28, %v2391_v34  ;;  %v2467_v55 = vadd.f32 %v10051_v5, %v2393_v3  ;;  %v8764_v3 = vld [vmem:[%s10007_s5] sm:$0xff] }
 0x194   :  { %10050 = vst [vmem:[#allocation26_spill] sm:$0xff] %v9477_v46  ;;  %v3300_v15 = vpop.f32.mrf.mxu1  ;;  %v2656_v46 = vadd.f32 %v2655_v51, %v2573_v54  ;;  %v1993_v54 = vadd.f32 %v9454_v7, %v1919_v58  ;;  %v10052_v45 = vld [vmem:[#allocation24_spill] sm:$0xff] }
 0x195   :  { %v3559_v17 = vpop.f32.mrf.mxu0  ;;  %v3227_v10 = vadd.f32 %v3226_v56, %v3150_v16  ;;  %v3301_v18 = vadd.f32 %v3300_v15, %v3225_v47  ;;  %v2959_v59 = vadd.f32 %v10052_v45, %v2885_v0  ;;  %v8807_v0 = vld [vmem:[%s10006_s4 + $0x8] sm:$0xff]  ;;  %v10057_v45 = vld [vmem:[#allocation6_spill] sm:$0xff] }
 0x196   :  { %v3302_v23 = vpop.f32.mrf.mxu1  ;;  %v2733_v26 = vadd.f32 %v2732_v38, %v2656_v46  ;;  %v10055_v39 = vld [vmem:[#allocation25_spill] sm:$0xff] }
 0x197   :  { %v3561_v24 = vpop.f32.mrf.mxu0  ;;  %v3379_v48 = vadd.f32 %v9474_v11, %v3301_v18 }
 0x198   :  { %v9480_v2 = vpop.f32.mrf.mxu1  ;;  %v2809_v27 = vadd.f32 %v2808_v49, %v2733_v26 }
 0x199   :  { %v3718_v50 = vpop.f32.mrf.mxu0  ;;  %v3453_v11 = vadd.f32 %v9480_v2, %v3379_v48 }
 0x19a   :  { %v9483_v57 = vpop.f32.mrf.mxu1  ;;  %v2887_v15 = vadd.f32 %v9468_v53, %v2809_v27 }
 0x19b   :  { %v3720_v8 = vpop.f32.mrf.mxu0  ;;  %v10053_v13 = vld [vmem:[#allocation26_spill] sm:$0xff] }
 0x19c   :  { %v3641_v4 = vpop.f32.mrf.mxu1  ;;  %v2961_v53 = vadd.f32 %v10055_v39, %v2887_v15 }
 0x19d   :  { %v3642_v31 = vadd.f32 %v3641_v4, %v3559_v17  ;;  %v3872_v44 = vpop.f32.mrf.mxu0  ;;  %v1499_v17 = vadd.f32 %v9444_v35, %v1425_v19  ;;  %v2470_v4 = vadd.f32 %v2467_v55, %v1998_v36 }
 0x19e   :  { %v3643_v60 = vpop.f32.mrf.mxu1 }
 0x19f   :  { %v3644_v42 = vadd.f32 %v3643_v60, %v3561_v24  ;;  %v3874_v63 = vpop.f32.mrf.mxu0  ;;  %v3719_v14 = vadd.f32 %v3718_v50, %v3642_v31  ;;  %v3303_v50 = vadd.f32 %v3302_v23, %v3227_v10  ;;  %v1503_v35 = vadd.f32 %v1499_v17, %v9436_v25 }
 0x1a0   :  { %v3794_v21 = vpop.f32.mrf.mxu1  ;;  %v2964_v60 = vadd.f32 %v2961_v53, %v2470_v4  ;;  %v10059_v53 = vld [vmem:[#allocation9_spill] sm:$0xff] }
 0x1a1   :  { %v4053_v52 = vpop.f32.mrf.mxu0  ;;  %v3721_v1 = vadd.f32 %v3720_v8, %v3644_v42  ;;  %v3795_v9 = vadd.f32 %v3794_v21, %v3719_v14  ;;  %v1997_v51 = vadd.f32 %v1993_v54, %v1503_v35  ;;  %v3381_v40 = vadd.f32 %v10053_v13, %v3303_v50 }
 0x1a2   :  { %v3796_v46 = vpop.f32.mrf.mxu1 }
 0x1a3   :  { %v4055_v24 = vpop.f32.mrf.mxu0  ;;  %v3797_v7 = vadd.f32 %v3796_v46, %v3721_v1  ;;  %v3873_v25 = vadd.f32 %v3872_v44, %v3795_v9  ;;  %v2469_v28 = vadd.f32 %v2465_v61, %v1997_v51  ;;  %v3455_v32 = vadd.f32 %v9483_v57, %v3381_v40 }
 0x1a4   :  { %v3946_v56 = vpop.f32.mrf.mxu1 }
 0x1a5   :  { %v4212_v38 = vpop.f32.mrf.mxu0  ;;  %v3875_v29 = vadd.f32 %v3874_v63, %v3797_v7  ;;  %v2963_v16 = vadd.f32 %v2959_v59, %v2469_v28  ;;  %v3947_v33 = vadd.f32 %v3946_v56, %v3873_v25  ;;  %v3458_v63 = vadd.f32 %v3455_v32, %v2964_v60 }
 0x1a6   :  { %v3948_v8 = vpop.f32.mrf.mxu1  ;;  %v4477_v56 = vsel %vm74_vm0, %v8807_v0, 0 }
 0x1a7   :  { %v4214_v49 = vpop.f32.mrf.mxu0  ;;  %v3457_v42 = vadd.f32 %v3453_v11, %v2963_v16  ;;  %v3949_v58 = vadd.f32 %v3948_v8, %v3875_v29  ;;  %v9549_v50 = vand.u32 4294901760, %v4477_v56  ;;  %v10060_v11 = vld [vmem:[#allocation8_spill] sm:$0xff] }
 0x1a8   :  { %v4135_v23 = vpop.f32.mrf.mxu1 }
 0x1a9   :  { %v4136_v62 = vadd.f32 %v4135_v23, %v4053_v52  ;;  %v3951_v10 = vadd.f32 %v3947_v33, %v3457_v42  ;;  %v3952_v34 = vadd.f32 %v3949_v58, %v3458_v63  ;;  %v9552_v9 = vsub.f32 %v4477_v56, %v9549_v50  ;;  %v10058_v23 = vld [vmem:[#allocation7_spill] sm:$0xff] }
 0x1aa   :  { %v4137_v6 = vpop.f32.mrf.mxu1  ;;  %v4366_v19 = vpop.f32.mrf.mxu0 }
 0x1ab   :  { %v4213_v37 = vadd.f32 %v4212_v38, %v4136_v62  ;;  %v4138_v41 = vadd.f32 %v4137_v6, %v4055_v24  ;;  %v4465_v38 = vld [vmem:[%s10006_s4] sm:$0xff]  ;;  %v4548_v12 = vand.u32 4294901760, %v9552_v9 }
 0x1ac   :  { %v4288_v31 = vpop.f32.mrf.mxu1  ;;  %v4368_v21 = vpop.f32.mrf.mxu0  ;;  %v4945_v61 = vsel %vm74_vm0, %v4465_v38, 0 }
 0x1ad   :  { %v4215_v44 = vadd.f32 %v4214_v49, %v4138_v41  ;;  %v4289_v26 = vadd.f32 %v4288_v31, %v4213_v37  ;;  %v4549_v8 = vsub.f32 %v9552_v9, %v4548_v12  ;;  %v9566_v5 = vand.u32 4294901760, %v4945_v61  ;;  %v8808_v41 = vld [vmem:[%s10006_s4 + $0x10] sm:$0xff] }
 0x1ae   :  { %v4290_v47 = vpop.f32.mrf.mxu1  ;;  %v5423_v42 = vsel %vm74_vm0, %v8808_v41, 0 }
 0x1af   :  { %v4367_v30 = vadd.f32 %v4366_v19, %v4289_v26  ;;  %v4291_v22 = vadd.f32 %v4290_v47, %v4215_v44  ;;  %v4550_v62 = vand.u32 4294901760, %v4549_v8  ;;  %v9577_v28 = vsub.f32 %v4945_v61, %v9566_v5 }
 0x1b0   :  { %v4440_v2 = vpop.f32.mrf.mxu1  ;;  %v10061_v26 = vmov 0.0  }
 0x1b1   :  { %v4369_v14 = vadd.f32 %v4368_v21, %v4291_v22  ;;  %v4441_v52 = vadd.f32 %v4440_v2, %v4367_v30  ;;  %v5016_v60 = vand.u32 4294901760, %v9577_v28  ;;  %v10062_v2 = vld [vmem:[#allocation10_spill] sm:$0xff] }
 0x1b2   :  { %v4442_v17 = vpop.f32.mrf.mxu1 }
 0x1b3   :  { %v4445_v27 = vadd.f32 %v4441_v52, %v3951_v10  ;;  %v4443_v57 = vadd.f32 %v4442_v17, %v4369_v14  ;;  %v5017_v52 = vsub.f32 %v9577_v28, %v5016_v60 }
 0x1b5   :  { %v4446_v46 = vadd.f32 %v4443_v57, %v3952_v34  ;;  %v4453_v18 = vadd.f32 %v4451_v43, %v4445_v27  ;;  %v10063_v27 = vld [vmem:[#allocation11_spill] sm:$0xff] }
 0x1b7   :  { %v4454_v1 = vadd.f32 %v4451_v43, %v4446_v46  ;;  %v9506_v24 = vmax.f32 %v4453_v18, 0.0  ;;  %v9605_v43 = vand.u32 4294901760, %v5423_v42 }
 0x1b9   :  { %4457 = vrot.lane.b32.xlu0 %v9506_v24, %s8852_s24  ;;  %4466 = vrot.lane.b32.xlu1 %v9506_v24, %s8851_s23  ;;  %v9512_v54 = vmax.f32 %v4454_v1, 0.0  ;;  %v5018_v1 = vand.u32 4294901760, %v5017_v52 }
 0x1bd   :  { %5412 = vrot.lane.b32.xlu0 %v9506_v24, %s8854_s27  ;;  %4468 = vrot.lane.b32.xlu1 %v9512_v54, %s8851_s23 }
 0x1c1   :  { %5892 = vrot.lane.b32.xlu0 %v9506_v24, %s8855_s28  ;;  %4459 = vrot.lane.b32.xlu1 %v9512_v54, %s8852_s24 }
 0x1c5   :  { %6844 = vrot.lane.b32.xlu0 %v9506_v24, %s8856_s29  ;;  %5414 = vrot.lane.b32.xlu1 %v9512_v54, %s8854_s27 }
 0x1c9   :  { %7324 = vrot.lane.b32.xlu0 %v9506_v24, %s8857_s30  ;;  %5894 = vrot.lane.b32.xlu1 %v9512_v54, %s8855_s28 }
 0x1cd   :  { %7804 = vrot.lane.b32.xlu0 %v9506_v24, %s8858_s7  ;;  %6846 = vrot.lane.b32.xlu1 %v9512_v54, %s8856_s29 }
 0x1d1   :  { %8284 = vrot.lane.b32.xlu0 %v9506_v24, %s8859_s8  ;;  %7326 = vrot.lane.b32.xlu1 %v9512_v54, %s8857_s30 }
 0x1d5   :  { %8767 = vperm.xlu0 %8826, %v8764_v3   ;;  %7806 = vrot.lane.b32.xlu1 %v9512_v54, %s8858_s7  ;;  %v9615_v3 = vsub.f32 %v5423_v42, %v9605_v43 }
 0x1d9   :  { %8286 = vrot.lane.b32.xlu1 %v9512_v54, %s8859_s8 }
 0x22b   :  { %v4467_v35 = vpop.permute.xlu1 %4466  ;;  %v4458_v55 = vpop.permute.xlu0 %4457 }
 0x22f   :  { %v4469_v15 = vpop.permute.xlu1 %4468  ;;  %v5413_v4 = vpop.permute.xlu0 %5412 }
 0x230   :  { %v4470_v7 = vsel %vm54_vm1, %v4467_v35, %v4469_v15  ;;  %v4471_v51 = vsel %vm54_vm1, %v4469_v15, %v4467_v35  ;;  %v8809_v35 = vld [vmem:[%s10006_s4 + $0x18] sm:$0xff] }
 0x231   :  { %v4472_v59 = vmul.f32 %v4471_v51, %v10057_v45  ;;  %v4473_v49 = vmul.f32 %v4470_v7, %v10058_v23  ;;  %v5494_v51 = vand.u32 4294901760, %v9615_v3 }
 0x233   :  { %v4509_v13 = vand.u32 4294901760, %v4473_v49  ;;  %v9570_v40 = vand.u32 4294901760, %v4472_v59  ;;  %v4460_v25 = vpop.permute.xlu1 %4459  ;;  %v5893_v61 = vpop.permute.xlu0 %5892 }
 0x234   :  { %v4461_v20 = vsel %vm32_vm2, %v4458_v55, %v4460_v25  ;;  %v4462_v36 = vsel %vm32_vm2, %v4460_v25, %v4458_v55  ;;  %v5903_v55 = vsel %vm74_vm0, %v8809_v35, 0 }
 0x235   :  { %v4594_v39 = vsub.f32 %v4472_v59, %v9570_v40  ;;  %v4463_v6 = vmul.f32 %v4462_v36, %v10059_v53  ;;  %v4464_v29 = vmul.f32 %v4461_v20, %v10060_v11  ;;  %4510 = vmatprep.subr.mxu0 %v4509_v13  ;;  %v4588_v37 = vsub.f32 %v4473_v49, %v4509_v13  ;;  %v10064_v59 = vld [vmem:[#allocation12_spill] sm:$0xff] }
 0x236   :  { %4512 = vmatpush1.msra.mxu0 %v9570_v40 }
 0x237   :  { %v9586_v16 = vand.u32 4294901760, %v4464_v29  ;;  %v9588_v31 = vand.u32 4294901760, %v4463_v6  ;;  %4551 = vmatmul.mubr.f32.vlgmr.msra.gmra.mxu0 %v4550_v62  ;;  %4671 = vmatprep.subr.mxu0 %v4588_v37  ;;  %v5415_v19 = vpop.permute.xlu1 %5414  ;;  %v4589_v32 = vand.u32 4294901760, %v4588_v37  ;;  %v4595_v33 = vand.u32 4294901760, %v4594_v39  ;;  %v10065_v62 = vld [vmem:[#allocation13_spill] sm:$0xff] }
 0x238   :  { %v5416_v44 = vsel %vm1015_vm3, %v5413_v4, %v5415_v19  ;;  %4674 = vmatpush1.msra.mxu0 %v4594_v39  ;;  %4707 = vmatprep.mubr.f32.mxu0 %v10061_v26  ;;  %v5417_v21 = vsel %vm1015_vm3, %v5415_v19, %v5413_v4 }
 0x239   :  { %4825 = vmatprep.subr.mxu0 %v4589_v32  ;;  %v4590_v47 = vsub.f32 %v4588_v37, %v4589_v32  ;;  %v5062_v58 = vsub.f32 %v4463_v6, %v9588_v31  ;;  %v4596_v30 = vsub.f32 %v4594_v39, %v4595_v33  ;;  %v5056_v22 = vsub.f32 %v4464_v29, %v9586_v16  ;;  %v8810_v29 = vld [vmem:[%s10006_s4 + $0x20] sm:$0xff] }
 0x23a   :  { %v5419_v63 = vmul.f32 %v5416_v44, %v10062_v2  ;;  %v5418_v57 = vmul.f32 %v5417_v21, %v10063_v27  ;;  %v8811_v21 = vld [vmem:[%s10006_s4 + $0x28] sm:$0xff]  ;;  %v6845_v2 = vpop.permute.xlu0 %6844 }
 0x23b   :  { %4710 = vmatmul.mubr.f32.vlgmr.msra.gmra.mxu0 %v9552_v9  ;;  %v4591_v10 = vand.u32 4294901760, %v4590_v47  ;;  %v4597_v14 = vand.u32 4294901760, %v4596_v30  ;;  %v5057_v17 = vand.u32 4294901760, %v5056_v22  ;;  %v5063_v34 = vand.u32 4294901760, %v5062_v58  ;;  %v5895_v0 = vpop.permute.xlu1 %5894 }
 0x23c   :  { %4829 = vmatpush1.msra.mxu0 %v4595_v33  ;;  %4862 = vmatprep.mubr.f32.mxu0 %v10061_v26  ;;  %v9609_v46 = vand.u32 4294901760, %v5419_v63  ;;  %v9618_v56 = vand.u32 4294901760, %v5418_v57  ;;  %v5896_v7 = vsel %vm1509_vm4, %v5893_v61, %v5895_v0 }
 0x23d   :  { %4978 = vmatprep.subr.mxu0 %v9586_v16  ;;  %4592 = vmatprep.subr.mxu1 %v4591_v10  ;;  %v5058_v18 = vsub.f32 %v5056_v22, %v5057_v17  ;;  %v5064_v38 = vsub.f32 %v5062_v58, %v5063_v34  ;;  %v5899_v23 = vmul.f32 %v5896_v7, %v10064_v59 }
 0x23e   :  { %4598 = vmatpush1.msra.mxu1 %v4597_v14  ;;  %v5534_v8 = vsub.f32 %v5419_v63, %v9609_v46  ;;  %v5540_v45 = vsub.f32 %v5418_v57, %v9618_v56  ;;  %v10066_v57 = vld [vmem:[#allocation14_spill] sm:$0xff] }
 0x23f   :  { %4633 = vmatmul.mubr.f32.vlgmr.msra.gmra.mxu1 %v9549_v50  ;;  %4747 = vmatprep.subr.mxu1 %v4509_v13  ;;  %v5059_v15 = vand.u32 4294901760, %v5058_v18  ;;  %v5065_v9 = vand.u32 4294901760, %v5064_v38 }
 0x240   :  { %4864 = vmatmul.mubr.f32.vlgmr.msra.gmra.mxu0 %v9549_v50  ;;  %4749 = vmatpush1.msra.mxu1 %v9570_v40  ;;  %v5535_v49 = vand.u32 4294901760, %v5534_v8  ;;  %v5541_v25 = vand.u32 4294901760, %v5540_v45 }
 0x241   :  { %4980 = vmatpush1.msra.mxu0 %v9588_v31  ;;  %4901 = vmatprep.subr.mxu1 %v4509_v13  ;;  %v5495_v13 = vsub.f32 %v9615_v3, %v5494_v51 }
 0x242   :  { %5139 = vmatprep.subr.mxu0 %v5056_v22  ;;  %4782 = vmatprep.mubr.f32.mxu1 %v10061_v26  ;;  %v5536_v36 = vsub.f32 %v5534_v8, %v5535_v49  ;;  %v5542_v11 = vsub.f32 %v5540_v45, %v5541_v25  ;;  %v9701_v22 = vand.u32 4294901760, %v9506_v24 }
 0x243   :  { %5013 = vmatprep.mubr.f32.mxu0 %v10061_v26  ;;  %4786 = vmatmul.mubr.f32.vlgmr.msra.gmra.mxu1 %v4548_v12  ;;  %v5897_v12 = vsel %vm1509_vm4, %v5895_v0, %v5893_v61  ;;  %v5496_v39 = vand.u32 4294901760, %v5495_v13 }
 0x244   :  { %4903 = vmatpush1.msra.mxu1 %v9570_v40  ;;  %5019 = vmatmul.mubr.f32.vlgmr.msra.gmra.mxu0 %v5018_v1  ;;  %v9644_v40 = vand.u32 4294901760, %v5903_v55  ;;  %v5898_v20 = vmul.f32 %v5897_v12, %v10065_v62  ;;  %v5537_v37 = vand.u32 4294901760, %v5536_v36  ;;  %v5543_v32 = vand.u32 4294901760, %v5542_v11  ;;  %v10068_v62 = vld [vmem:[#allocation16_spill] sm:$0xff] }
 0x245   :  { %5142 = vmatpush1.msra.mxu0 %v5062_v58  ;;  %5060 = vmatprep.subr.mxu1 %v5059_v15  ;;  %v6847_v58 = vpop.permute.xlu1 %6846  ;;  %v6492_v27 = vsub.f32 %v9506_v24, %v9701_v22  ;;  %v10067_v24 = vld [vmem:[#allocation15_spill] sm:$0xff] }
 0x246   :  { %5293 = vmatprep.subr.mxu0 %v5057_v17  ;;  %4936 = vmatprep.mubr.f32.mxu1 %v10061_v26  ;;  %v9657_v53 = vsub.f32 %v5903_v55, %v9644_v40  ;;  %v9661_v6 = vand.u32 4294901760, %v5898_v20  ;;  %v6849_v14 = vsel %vm2475_vm5, %v6847_v58, %v6845_v2  ;;  %v6855_v17 = vsel %vm74_vm0, %v8811_v21, 0  ;;  %v7325_v55 = vpop.permute.xlu0 %7324  ;;  %v10070_v21 = vld [vmem:[#allocation18_spill] sm:$0xff] }
 0x247   :  { %5175 = vmatprep.mubr.f32.mxu0 %v10061_v26  ;;  %4938 = vmatmul.mubr.f32.vlgmr.msra.gmra.mxu1 %v9549_v50  ;;  %v9650_v50 = vand.u32 4294901760, %v5899_v23 }
 0x248   :  { %5066 = vmatpush1.msra.mxu1 %v5065_v9  ;;  %5178 = vmatmul.mubr.f32.vlgmr.msra.gmra.mxu0 %v9577_v28  ;;  %v5974_v4 = vand.u32 4294901760, %v9657_v53  ;;  %v6020_v19 = vsub.f32 %v5898_v20, %v9661_v6 }
 0x249   :  { %5297 = vmatpush1.msra.mxu0 %v5063_v34  ;;  %5215 = vmatprep.subr.mxu1 %v9586_v16  ;;  %v6014_v41 = vsub.f32 %v5899_v23, %v9650_v50  ;;  %v7327_v15 = vpop.permute.xlu1 %7326 }
 0x24a   :  { %5456 = vmatprep.subr.mxu0 %v9609_v46  ;;  %5099 = vmatprep.mubr.f32.mxu1 %v10061_v26  ;;  %v6021_v44 = vand.u32 4294901760, %v6020_v19  ;;  %v7329_v12 = vsel %vm2969_vm6, %v7327_v15, %v7325_v55 }
 0x24b   :  { %5330 = vmatprep.mubr.f32.mxu0 %v10061_v26  ;;  %5101 = vmatmul.mubr.f32.vlgmr.msra.gmra.mxu1 %v9566_v5  ;;  %v6015_v28 = vand.u32 4294901760, %v6014_v41  ;;  %v7331_v20 = vmul.f32 %v7329_v12, %v10068_v62  ;;  %v10073_v12 = vld [vmem:[#allocation21_spill] sm:$0xff] }
 0x24c   :  { %5217 = vmatpush1.msra.mxu1 %v9588_v31  ;;  %5332 = vmatmul.mubr.f32.vlgmr.msra.gmra.mxu0 %v9566_v5  ;;  %v6022_v30 = vsub.f32 %v6020_v19, %v6021_v44 }
 0x24d   :  { %5458 = vmatpush1.msra.mxu0 %v9618_v56  ;;  %5369 = vmatprep.subr.mxu1 %v9586_v16  ;;  %v6375_v16 = vsel %vm74_vm0, %v8810_v29, 0 }
 0x24e   :  { %5617 = vmatprep.subr.mxu0 %v5534_v8  ;;  %5250 = vmatprep.mubr.f32.mxu1 %v10061_v26  ;;  %v9682_v33 = vand.u32 4294901760, %v6375_v16  ;;  %v6023_v34 = vand.u32 4294901760, %v6022_v30 }
 0x24f   :  { %5491 = vmatprep.mubr.f32.mxu0 %v10061_v26  ;;  %5254 = vmatmul.mubr.f32.vlgmr.msra.gmra.mxu1 %v5016_v60  ;;  %v9690_v60 = vand.u32 4294901760, %v9512_v54 }
 0x250   :  { %5371 = vmatpush1.msra.mxu1 %v9588_v31  ;;  %5497 = vmatmul.mubr.f32.vlgmr.msra.gmra.mxu0 %v5496_v39  ;;  %v5975_v31 = vsub.f32 %v9657_v53, %v5974_v4  ;;  %v9695_v42 = vsub.f32 %v6375_v16, %v9682_v33 }
 0x251   :  { %5620 = vmatpush1.msra.mxu0 %v5540_v45  ;;  %5538 = vmatprep.subr.mxu1 %v5537_v37  ;;  %v6486_v10 = vsub.f32 %v9512_v54, %v9690_v60  ;;  %v6848_v54 = vsel %vm2475_vm5, %v6845_v2, %v6847_v58 }
 0x252   :  { %5771 = vmatprep.subr.mxu0 %v5535_v49  ;;  %5404 = vmatprep.mubr.f32.mxu1 %v10061_v26  ;;  %v5976_v47 = vand.u32 4294901760, %v5975_v31  ;;  %v6446_v52 = vand.u32 4294901760, %v9695_v42  ;;  %v6850_v0 = vmul.f32 %v6848_v54, %v10067_v24 }
 0x253   :  { %5653 = vmatprep.mubr.f32.mxu0 %v10061_v26  ;;  %5406 = vmatmul.mubr.f32.vlgmr.msra.gmra.mxu1 %v9566_v5  ;;  %v6016_v5 = vsub.f32 %v6014_v41, %v6015_v28  ;;  %v6487_v18 = vand.u32 4294901760, %v6486_v10 }
 0x254   :  { %5544 = vmatpush1.msra.mxu1 %v5543_v32  ;;  %5656 = vmatmul.mubr.f32.vlgmr.msra.gmra.mxu0 %v9615_v3  ;;  %v6447_v1 = vsub.f32 %v9695_v42, %v6446_v52  ;;  %v9728_v3 = vand.u32 4294901760, %v6855_v17  ;;  %v9745_v8 = vand.u32 4294901760, %v6850_v0  ;;  %v8813_v32 = vld [vmem:[%s10006_s4 + $0x38] sm:$0xff] }
 0x255   :  { %5775 = vmatpush1.msra.mxu0 %v5541_v25  ;;  %5693 = vmatprep.subr.mxu1 %v9609_v46  ;;  %v6017_v63 = vand.u32 4294901760, %v6016_v5  ;;  %v6488_v38 = vsub.f32 %v6486_v10, %v6487_v18  ;;  %v7328_v25 = vsel %vm2969_vm6, %v7325_v55, %v7327_v15 }
 0x256   :  { %5936 = vmatprep.subr.mxu0 %v9650_v50  ;;  %5577 = vmatprep.mubr.f32.mxu1 %v10061_v26  ;;  %v6448_v35 = vand.u32 4294901760, %v6447_v1  ;;  %v9741_v61 = vsub.f32 %v6855_v17, %v9728_v3  ;;  %v6972_v49 = vsub.f32 %v6850_v0, %v9745_v8  ;;  %v8814_v1 = vld [vmem:[%s10006_s4 + $0x40] sm:$0xff] }
 0x257   :  { %5808 = vmatprep.mubr.f32.mxu0 %v10061_v26  ;;  %5579 = vmatmul.mubr.f32.vlgmr.msra.gmra.mxu1 %v9605_v43  ;;  %v6489_v45 = vand.u32 4294901760, %v6488_v38 }
 0x258   :  { %5695 = vmatpush1.msra.mxu1 %v9618_v56  ;;  %5810 = vmatmul.mubr.f32.vlgmr.msra.gmra.mxu0 %v9605_v43  ;;  %v6926_v59 = vand.u32 4294901760, %v9741_v61 }
 0x259   :  { %5938 = vmatpush1.msra.mxu0 %v9661_v6  ;;  %5847 = vmatprep.subr.mxu1 %v9609_v46  ;;  %v6851_v46 = vmul.f32 %v6849_v14, %v10066_v57 }
 0x25a   :  { %6097 = vmatprep.subr.mxu0 %v6014_v41  ;;  %5728 = vmatprep.mubr.f32.mxu1 %v10061_v26  ;;  %v6927_v36 = vsub.f32 %v9741_v61, %v6926_v59 }
 0x25b   :  { %5971 = vmatprep.mubr.f32.mxu0 %v10061_v26  ;;  %5732 = vmatmul.mubr.f32.vlgmr.msra.gmra.mxu1 %v5494_v51  ;;  %v8812_v51 = vld [vmem:[%s10006_s4 + $0x30] sm:$0xff] }
 0x25c   :  { %5849 = vmatpush1.msra.mxu1 %v9618_v56  ;;  %5977 = vmatmul.mubr.f32.vlgmr.msra.gmra.mxu0 %v5976_v47  ;;  %v9734_v56 = vand.u32 4294901760, %v6851_v46  ;;  %v7335_v23 = vsel %vm74_vm0, %v8812_v51, 0  ;;  %v6928_v37 = vand.u32 4294901760, %v6927_v36  ;;  %v7815_v47 = vsel %vm74_vm0, %v8813_v32, 0  ;;  %v10072_v51 = vld [vmem:[#allocation20_spill] sm:$0xff] }
 0x25d   :  { %6100 = vmatpush1.msra.mxu0 %v6020_v19  ;;  %6018 = vmatprep.subr.mxu1 %v6017_v63  ;;  %v9771_v39 = vand.u32 4294901760, %v7335_v23 }
 0x25e   :  { %6251 = vmatprep.subr.mxu0 %v6015_v28  ;;  %5882 = vmatprep.mubr.f32.mxu1 %v10061_v26  ;;  %v6966_v9 = vsub.f32 %v6851_v46, %v9734_v56  ;;  %v7805_v28 = vpop.permute.xlu0 %7804 }
 0x25f   :  { %6133 = vmatprep.mubr.f32.mxu0 %v10061_v26  ;;  %5884 = vmatmul.mubr.f32.vlgmr.msra.gmra.mxu1 %v9605_v43  ;;  %v6493_v43 = vand.u32 4294901760, %v6492_v27  ;;  %v9784_v41 = vsub.f32 %v7335_v23, %v9771_v39 }
 0x260   :  { %6024 = vmatpush1.msra.mxu1 %v6023_v34  ;;  %6136 = vmatmul.mubr.f32.vlgmr.msra.gmra.mxu0 %v9657_v53  ;;  %v6973_v53 = vand.u32 4294901760, %v6972_v49 }
 0x261   :  { %6255 = vmatpush1.msra.mxu0 %v6021_v44  ;;  %6173 = vmatprep.subr.mxu1 %v9650_v50  ;;  %v6494_v7 = vsub.f32 %v6492_v27, %v6493_v43 }
 0x262   :  { %6408 = vmatprep.subr.mxu0 %v9690_v60  ;;  %6057 = vmatprep.mubr.f32.mxu1 %v10061_v26  ;;  %v6974_v19 = vsub.f32 %v6972_v49, %v6973_v53  ;;  %v8285_v24 = vpop.permute.xlu0 %8284 }
 0x263   :  { %6288 = vmatprep.mubr.f32.mxu0 %v10061_v26  ;;  %6059 = vmatmul.mubr.f32.vlgmr.msra.gmra.mxu1 %v9644_v40  ;;  %v6495_v13 = vand.u32 4294901760, %v6494_v7 }
 0x264   :  { %6175 = vmatpush1.msra.mxu1 %v9661_v6  ;;  %6290 = vmatmul.mubr.f32.vlgmr.msra.gmra.mxu0 %v9644_v40 }
 0x265   :  { %6410 = vmatpush1.msra.mxu0 %v9701_v22  ;;  %6327 = vmatprep.subr.mxu1 %v9650_v50  ;;  %v6967_v50 = vand.u32 4294901760, %v6966_v9 }
 0x266   :  { %6569 = vmatprep.subr.mxu0 %v6486_v10  ;;  %6208 = vmatprep.mubr.f32.mxu1 %v10061_v26  ;;  %v9814_v10 = vand.u32 4294901760, %v7815_v47 }
 0x267   :  { %6443 = vmatprep.mubr.f32.mxu0 %v10061_v26  ;;  %6212 = vmatmul.mubr.f32.vlgmr.msra.gmra.mxu1 %v5974_v4  ;;  %v6968_v29 = vsub.f32 %v6966_v9, %v6967_v50  ;;  %v7807_v4 = vpop.permute.xlu1 %7806 }
 0x268   :  { %6329 = vmatpush1.msra.mxu1 %v9661_v6  ;;  %6449 = vmatmul.mubr.f32.vlgmr.msra.gmra.mxu0 %v6448_v35  ;;  %v10069_v6 = vld [vmem:[#allocation17_spill] sm:$0xff]  ;;  %v7809_v5 = vsel %vm3463_vm7, %v7807_v4, %v7805_v28  ;;  %v7808_v30 = vsel %vm3463_vm7, %v7805_v28, %v7807_v4  ;;  %v9827_v54 = vsub.f32 %v7815_v47, %v9814_v10  ;;  %v8295_v35 = vsel %vm74_vm0, %v8814_v1, 0 }
 0x269   :  { %6572 = vmatpush1.msra.mxu0 %v6492_v27  ;;  %6490 = vmatprep.subr.mxu1 %v6489_v45  ;;  %v7330_v11 = vmul.f32 %v7328_v25, %v10069_v6  ;;  %v6969_v31 = vand.u32 4294901760, %v6968_v29  ;;  %v7811_v2 = vmul.f32 %v7809_v5, %v10070_v21 }
 0x26a   :  { %6723 = vmatprep.subr.mxu0 %v6487_v18  ;;  %6362 = vmatprep.mubr.f32.mxu1 %v10061_v26  ;;  %v7886_v38 = vand.u32 4294901760, %v9827_v54 }
 0x26b   :  { %6605 = vmatprep.mubr.f32.mxu0 %v10061_v26  ;;  %6364 = vmatmul.mubr.f32.vlgmr.msra.gmra.mxu1 %v9644_v40  ;;  %v9777_v40 = vand.u32 4294901760, %v7331_v20  ;;  %v9788_v16 = vand.u32 4294901760, %v7330_v11  ;;  %v8287_v57 = vpop.permute.xlu1 %8286 }
 0x26c   :  { %6496 = vmatpush1.msra.mxu1 %v6495_v13  ;;  %6608 = vmatmul.mubr.f32.vlgmr.msra.gmra.mxu0 %v9695_v42  ;;  %v6975_v42 = vand.u32 4294901760, %v6974_v19  ;;  %v8288_v7 = vsel %vm3957_vm8, %v8285_v24, %v8287_v57  ;;  %v7887_v45 = vsub.f32 %v9827_v54, %v7886_v38 }
 0x26d   :  { %6727 = vmatpush1.msra.mxu0 %v6493_v43  ;;  %6645 = vmatprep.subr.mxu1 %v9690_v60  ;;  %v7446_v44 = vsub.f32 %v7331_v20, %v9777_v40  ;;  %v7452_v58 = vsub.f32 %v7330_v11, %v9788_v16 }
 0x26e   :  { %6888 = vmatprep.subr.mxu0 %v9734_v56  ;;  %6529 = vmatprep.mubr.f32.mxu1 %v10061_v26 }
 0x26f   :  { %6760 = vmatprep.mubr.f32.mxu0 %v10061_v26  ;;  %6531 = vmatmul.mubr.f32.vlgmr.msra.gmra.mxu1 %v9682_v33  ;;  %v7453_v14 = vand.u32 4294901760, %v7452_v58 }
 0x270   :  { %6647 = vmatpush1.msra.mxu1 %v9701_v22  ;;  %6762 = vmatmul.mubr.f32.vlgmr.msra.gmra.mxu0 %v9682_v33 }
 0x271   :  { %6890 = vmatpush1.msra.mxu0 %v9745_v8  ;;  %6799 = vmatprep.subr.mxu1 %v9690_v60  ;;  %v7406_v60 = vand.u32 4294901760, %v9784_v41  ;;  %v7454_v18 = vsub.f32 %v7452_v58, %v7453_v14 }
 0x272   :  { %7049 = vmatprep.subr.mxu0 %v6966_v9  ;;  %6680 = vmatprep.mubr.f32.mxu1 %v10061_v26  ;;  %v9857_v9 = vand.u32 4294901760, %v8295_v35 }
 0x273   :  { %6923 = vmatprep.mubr.f32.mxu0 %v10061_v26  ;;  %6684 = vmatmul.mubr.f32.vlgmr.msra.gmra.mxu1 %v6446_v52  ;;  %v7407_v63 = vsub.f32 %v9784_v41, %v7406_v60  ;;  %v10071_v52 = vld [vmem:[#allocation19_spill] sm:$0xff] }
 0x274   :  { %6801 = vmatpush1.msra.mxu1 %v9701_v22  ;;  %6929 = vmatmul.mubr.f32.vlgmr.msra.gmra.mxu0 %v6928_v37  ;;  %v7447_v22 = vand.u32 4294901760, %v7446_v44  ;;  %v7810_v17 = vmul.f32 %v7808_v30, %v10071_v52  ;;  %v9870_v13 = vsub.f32 %v8295_v35, %v9857_v9 }
 0x275   :  { %7052 = vmatpush1.msra.mxu0 %v6972_v49  ;;  %6970 = vmatprep.subr.mxu1 %v6969_v31  ;;  %v7408_v27 = vand.u32 4294901760, %v7407_v63  ;;  %v7888_v49 = vand.u32 4294901760, %v7887_v45 }
 0x276   :  { %7203 = vmatprep.subr.mxu0 %v6967_v50  ;;  %6834 = vmatprep.mubr.f32.mxu1 %v10061_v26  ;;  %v7448_v34 = vsub.f32 %v7446_v44, %v7447_v22  ;;  %v9831_v46 = vand.u32 4294901760, %v7810_v17  ;;  %v8366_v36 = vand.u32 4294901760, %v9870_v13 }
 0x277   :  { %7085 = vmatprep.mubr.f32.mxu0 %v10061_v26  ;;  %6836 = vmatmul.mubr.f32.vlgmr.msra.gmra.mxu1 %v9682_v33  ;;  %v9820_v33 = vand.u32 4294901760, %v7811_v2 }
 0x278   :  { %6976 = vmatpush1.msra.mxu1 %v6975_v42  ;;  %7088 = vmatmul.mubr.f32.vlgmr.msra.gmra.mxu0 %v9741_v61  ;;  %v7449_v0 = vand.u32 4294901760, %v7448_v34  ;;  %v7932_v15 = vsub.f32 %v7810_v17, %v9831_v46  ;;  %v7455_v61 = vand.u32 4294901760, %v7454_v18 }
 0x279   :  { %7207 = vmatpush1.msra.mxu0 %v6973_v53  ;;  %7125 = vmatprep.subr.mxu1 %v9734_v56  ;;  %v7926_v43 = vsub.f32 %v7811_v2, %v9820_v33 }
 0x27a   :  { %7368 = vmatprep.subr.mxu0 %v9777_v40  ;;  %7009 = vmatprep.mubr.f32.mxu1 %v10061_v26  ;;  %v7933_v48 = vand.u32 4294901760, %v7932_v15 }
 0x27b   :  { %7240 = vmatprep.mubr.f32.mxu0 %v10061_v26  ;;  %7011 = vmatmul.mubr.f32.vlgmr.msra.gmra.mxu1 %v9728_v3 }
 0x27c   :  { %7127 = vmatpush1.msra.mxu1 %v9745_v8  ;;  %7242 = vmatmul.mubr.f32.vlgmr.msra.gmra.mxu0 %v9728_v3  ;;  %v7934_v62 = vsub.f32 %v7932_v15, %v7933_v48 }
 0x27d   :  { %7370 = vmatpush1.msra.mxu0 %v9788_v16  ;;  %7279 = vmatprep.subr.mxu1 %v9734_v56  ;;  %v8289_v56 = vsel %vm3957_vm8, %v8287_v57, %v8285_v24 }
 0x27e   :  { %7529 = vmatprep.subr.mxu0 %v7446_v44  ;;  %7160 = vmatprep.mubr.f32.mxu1 %v10061_v26  ;;  %v8291_v55 = vmul.f32 %v8289_v56, %v10072_v51  ;;  %v7935_v6 = vand.u32 4294901760, %v7934_v62 }
 0x27f   :  { %7403 = vmatprep.mubr.f32.mxu0 %v10061_v26  ;;  %7164 = vmatmul.mubr.f32.vlgmr.msra.gmra.mxu1 %v6926_v59  ;;  %v8290_v59 = vmul.f32 %v8288_v7, %v10073_v12 }
 0x280   :  { %7281 = vmatpush1.msra.mxu1 %v9745_v8  ;;  %7409 = vmatmul.mubr.f32.vlgmr.msra.gmra.mxu0 %v7408_v27  ;;  %v7927_v8 = vand.u32 4294901760, %v7926_v43 }
 0x281   :  { %7532 = vmatpush1.msra.mxu0 %v7452_v58  ;;  %7450 = vmatprep.subr.mxu1 %v7449_v0  ;;  %v8329_v25 = vand.u32 4294901760, %v8290_v59 }
 0x282   :  { %7683 = vmatprep.subr.mxu0 %v7447_v22  ;;  %7314 = vmatprep.mubr.f32.mxu1 %v10061_v26  ;;  %v7928_v23 = vsub.f32 %v7926_v43, %v7927_v8 }
 0x283   :  { %7565 = vmatprep.mubr.f32.mxu0 %v10061_v26  ;;  %7316 = vmatmul.mubr.f32.vlgmr.msra.gmra.mxu1 %v9728_v3  ;;  %v9863_v3 = vand.u32 4294901760, %v8291_v55  ;;  %v8412_v53 = vsub.f32 %v8290_v59, %v8329_v25 }
 0x284   :  { %7456 = vmatpush1.msra.mxu1 %v7455_v61  ;;  %7568 = vmatmul.mubr.f32.vlgmr.msra.gmra.mxu0 %v9784_v41  ;;  %v7929_v20 = vand.u32 4294901760, %v7928_v23 }
 0x285   :  { %7687 = vmatpush1.msra.mxu0 %v7453_v14  ;;  %7605 = vmatprep.subr.mxu1 %v9777_v40  ;;  %v8406_v50 = vsub.f32 %v8291_v55, %v9863_v3  ;;  %v8413_v29 = vand.u32 4294901760, %v8412_v53 }
 0x286   :  { %7848 = vmatprep.subr.mxu0 %v9820_v33  ;;  %7489 = vmatprep.mubr.f32.mxu1 %v10061_v26 }
 0x287   :  { %7720 = vmatprep.mubr.f32.mxu0 %v10061_v26  ;;  %7491 = vmatmul.mubr.f32.vlgmr.msra.gmra.mxu1 %v9771_v39  ;;  %v8407_v11 = vand.u32 4294901760, %v8406_v50  ;;  %v8414_v41 = vsub.f32 %v8412_v53, %v8413_v29 }
 0x288   :  { %7607 = vmatpush1.msra.mxu1 %v9788_v16  ;;  %7722 = vmatmul.mubr.f32.vlgmr.msra.gmra.mxu0 %v9771_v39 }
 0x289   :  { %7850 = vmatpush1.msra.mxu0 %v9831_v46  ;;  %7759 = vmatprep.subr.mxu1 %v9777_v40  ;;  %v8367_v40 = vsub.f32 %v9870_v13, %v8366_v36  ;;  %v8408_v37 = vsub.f32 %v8406_v50, %v8407_v11 }
 0x28a   :  { %8009 = vmatprep.subr.mxu0 %v7926_v43  ;;  %7640 = vmatprep.mubr.f32.mxu1 %v10061_v26 }
 0x28b   :  { %7883 = vmatprep.mubr.f32.mxu0 %v10061_v26  ;;  %7644 = vmatmul.mubr.f32.vlgmr.msra.gmra.mxu1 %v7406_v60  ;;  %v8409_v4 = vand.u32 4294901760, %v8408_v37 }
 0x28c   :  { %7761 = vmatpush1.msra.mxu1 %v9788_v16  ;;  %7889 = vmatmul.mubr.f32.vlgmr.msra.gmra.mxu0 %v7888_v49  ;;  %v8415_v16 = vand.u32 4294901760, %v8414_v41 }
 0x28d   :  { %8012 = vmatpush1.msra.mxu0 %v7932_v15  ;;  %7930 = vmatprep.subr.mxu1 %v7929_v20 }
 0x28e   :  { %8163 = vmatprep.subr.mxu0 %v7927_v8  ;;  %7794 = vmatprep.mubr.f32.mxu1 %v10061_v26 }
 0x28f   :  { %8045 = vmatprep.mubr.f32.mxu0 %v10061_v26  ;;  %7796 = vmatmul.mubr.f32.vlgmr.msra.gmra.mxu1 %v9771_v39  ;;  %v8368_v39 = vand.u32 4294901760, %v8367_v40 }
 0x290   :  { %7936 = vmatpush1.msra.mxu1 %v7935_v6  ;;  %8048 = vmatmul.mubr.f32.vlgmr.msra.gmra.mxu0 %v9827_v54 }
 0x291   :  { %8167 = vmatpush1.msra.mxu0 %v7933_v48  ;;  %8085 = vmatprep.subr.mxu1 %v9820_v33 }
 0x292   :  { %8328 = vmatprep.subr.mxu0 %v9863_v3  ;;  %7969 = vmatprep.mubr.f32.mxu1 %v10061_v26 }
 0x293   :  { %8200 = vmatprep.mubr.f32.mxu0 %v10061_v26  ;;  %7971 = vmatmul.mubr.f32.vlgmr.msra.gmra.mxu1 %v9814_v10 }
 0x294   :  { %8087 = vmatpush1.msra.mxu1 %v9831_v46  ;;  %8202 = vmatmul.mubr.f32.vlgmr.msra.gmra.mxu0 %v9814_v10 }
 0x295   :  { %8330 = vmatpush1.msra.mxu0 %v8329_v25  ;;  %8239 = vmatprep.subr.mxu1 %v9820_v33 }
 0x296   :  { %8489 = vmatprep.subr.mxu0 %v8406_v50  ;;  %8120 = vmatprep.mubr.f32.mxu1 %v10061_v26 }
 0x297   :  { %8363 = vmatprep.mubr.f32.mxu0 %v10061_v26  ;;  %8124 = vmatmul.mubr.f32.vlgmr.msra.gmra.mxu1 %v7886_v38 }
 0x298   :  { %8241 = vmatpush1.msra.mxu1 %v9831_v46  ;;  %8369 = vmatmul.mubr.f32.vlgmr.msra.gmra.mxu0 %v8368_v39 }
 0x299   :  { %8492 = vmatpush1.msra.mxu0 %v8412_v53  ;;  %8410 = vmatprep.subr.mxu1 %v8409_v4 }
 0x29a   :  { %8643 = vmatprep.subr.mxu0 %v8407_v11  ;;  %8274 = vmatprep.mubr.f32.mxu1 %v10061_v26 }
 0x29b   :  { %8525 = vmatprep.mubr.f32.mxu0 %v10061_v26  ;;  %8276 = vmatmul.mubr.f32.vlgmr.msra.gmra.mxu1 %v9814_v10 }
 0x29c   :  { %8416 = vmatpush1.msra.mxu1 %v8415_v16  ;;  %8528 = vmatmul.mubr.f32.vlgmr.msra.gmra.mxu0 %v9870_v13 }
 0x29d   :  { %8647 = vmatpush1.msra.mxu0 %v8413_v29  ;;  %8565 = vmatprep.subr.mxu1 %v9863_v3 }
 0x29e   :  { %8449 = vmatprep.mubr.f32.mxu1 %v10061_v26  ;;  %8680 = vmatprep.mubr.f32.mxu0 %v10061_v26 }
 0x29f   :  { %8451 = vmatmul.mubr.f32.vlgmr.msra.gmra.mxu1 %v9857_v9 }
 0x2a0   :  { %8567 = vmatpush1.msra.mxu1 %v8329_v25  ;;  %8600 = vmatprep.mubr.f32.mxu1 %v10061_v26 }
 0x2a1   :  { %8719 = vmatprep.subr.mxu1 %v9863_v3  ;;  %8682 = vmatmul.mubr.f32.vlgmr.msra.gmra.mxu0 %v9857_v9 }
 0x2a3   :  { %8604 = vmatmul.mubr.f32.vlgmr.msra.gmra.mxu1 %v8366_v36 }
 0x2a4   :  { %8721 = vmatpush1.msra.mxu1 %v8329_v25  ;;  %8754 = vmatprep.mubr.f32.mxu1 %v10061_v26 }
 0x2a7   :  { %8756 = vmatmul.mubr.f32.vlgmr.msra.gmra.mxu1 %v9857_v9 }
 0x2f7   :  { %v4552_v19 = vpop.f32.mrf.mxu0 }
 0x2f9   :  { %v4554_v32 = vpop.f32.mrf.mxu0 }
 0x2fb   :  { %v4711_v28 = vpop.f32.mrf.mxu0 }
 0x2fd   :  { %v4713_v31 = vpop.f32.mrf.mxu0 }
 0x2ff   :  { %v4634_v44 = vpop.f32.mrf.mxu1 }
 0x300   :  { %v4635_v5 = vadd.f32 %v4634_v44, %v4552_v19  ;;  %v4865_v60 = vpop.f32.mrf.mxu0 }
 0x301   :  { %v4636_v47 = vpop.f32.mrf.mxu1 }
 0x302   :  { %v4637_v58 = vadd.f32 %v4636_v47, %v4554_v32  ;;  %v4712_v42 = vadd.f32 %v4711_v28, %v4635_v5  ;;  %v4867_v30 = vpop.f32.mrf.mxu0 }
 0x303   :  { %v4787_v21 = vpop.f32.mrf.mxu1 }
 0x304   :  { %v4714_v2 = vadd.f32 %v4713_v31, %v4637_v58  ;;  %v4788_v22 = vadd.f32 %v4787_v21, %v4712_v42  ;;  %v5020_v63 = vpop.f32.mrf.mxu0 }
 0x305   :  { %v4789_v10 = vpop.f32.mrf.mxu1 }
 0x306   :  { %v4790_v14 = vadd.f32 %v4789_v10, %v4714_v2  ;;  %v4866_v26 = vadd.f32 %v4865_v60, %v4788_v22  ;;  %v5022_v52 = vpop.f32.mrf.mxu0 }
 0x307   :  { %v4939_v17 = vpop.f32.mrf.mxu1 }
 0x308   :  { %v4868_v33 = vadd.f32 %v4867_v30, %v4790_v14  ;;  %v4940_v34 = vadd.f32 %v4939_v17, %v4866_v26  ;;  %v5179_v27 = vpop.f32.mrf.mxu0 }
 0x309   :  { %v4941_v54 = vpop.f32.mrf.mxu1 }
 0x30a   :  { %v4942_v57 = vadd.f32 %v4941_v54, %v4868_v33  ;;  %v5021_v46 = vadd.f32 %v5020_v63, %v4940_v34  ;;  %v5181_v18 = vpop.f32.mrf.mxu0 }
 0x30b   :  { %v5102_v1 = vpop.f32.mrf.mxu1 }
 0x30c   :  { %v5023_v24 = vadd.f32 %v5022_v52, %v4942_v57  ;;  %v5103_v0 = vadd.f32 %v5102_v1, %v5021_v46  ;;  %v5333_v43 = vpop.f32.mrf.mxu0 }
 0x30d   :  { %v5104_v56 = vpop.f32.mrf.mxu1 }
 0x30e   :  { %v5105_v38 = vadd.f32 %v5104_v56, %v5023_v24  ;;  %v5180_v35 = vadd.f32 %v5179_v27, %v5103_v0  ;;  %v5335_v15 = vpop.f32.mrf.mxu0 }
 0x30f   :  { %v5255_v61 = vpop.f32.mrf.mxu1 }
 0x310   :  { %v5182_v7 = vadd.f32 %v5181_v18, %v5105_v38  ;;  %v5256_v51 = vadd.f32 %v5255_v61, %v5180_v35  ;;  %v5498_v55 = vpop.f32.mrf.mxu0 }
 0x311   :  { %v5257_v8 = vpop.f32.mrf.mxu1 }
 0x312   :  { %v5258_v45 = vadd.f32 %v5257_v8, %v5182_v7  ;;  %v5334_v9 = vadd.f32 %v5333_v43, %v5256_v51  ;;  %v5500_v48 = vpop.f32.mrf.mxu0 }
 0x313   :  { %v5407_v12 = vpop.f32.mrf.mxu1 }
 0x314   :  { %v5336_v59 = vadd.f32 %v5335_v15, %v5258_v45  ;;  %v9912_v3 = vadd.f32 %v5407_v12, %v5334_v9  ;;  %v5657_v23 = vpop.f32.mrf.mxu0 }
 0x315   :  { %v5409_v49 = vpop.f32.mrf.mxu1 }
 0x316   :  { %10074 = vst [vmem:[#allocation23_spill] sm:$0xff] %v9912_v3  ;;  %v9914_v13 = vadd.f32 %v5409_v49, %v5336_v59  ;;  %v9916_v25 = vpop.f32.mrf.mxu0 }
 0x317   :  { %v5580_v62 = vpop.f32.mrf.mxu1 }
 0x318   :  { %10075 = vst [vmem:[#allocation24_spill] sm:$0xff] %v9914_v13  ;;  %v9918_v20 = vpop.f32.mrf.mxu0  ;;  %v5581_v7 = vadd.f32 %v5580_v62, %v5498_v55 }
 0x319   :  { %v5582_v50 = vpop.f32.mrf.mxu1 }
 0x31a   :  { %v9920_v36 = vpop.f32.mrf.mxu0  ;;  %v5583_v45 = vadd.f32 %v5582_v50, %v5500_v48  ;;  %v5658_v49 = vadd.f32 %v5657_v23, %v5581_v7 }
 0x31b   :  { %v9922_v53 = vpop.f32.mrf.mxu1 }
 0x31c   :  { %v5978_v6 = vpop.f32.mrf.mxu0  ;;  %v5734_v62 = vadd.f32 %v9922_v53, %v5658_v49 }
 0x31d   :  { %v9924_v11 = vpop.f32.mrf.mxu1 }
 0x31e   :  { %v5980_v40 = vpop.f32.mrf.mxu0 }
 0x31f   :  { %v9926_v29 = vpop.f32.mrf.mxu1  ;;  %v10089_v49 = vld [vmem:[#allocation24_spill] sm:$0xff] }
 0x320   :  { %v6137_v37 = vpop.f32.mrf.mxu0 }
 0x321   :  { %v9928_v39 = vpop.f32.mrf.mxu1 }
 0x322   :  { %v6139_v41 = vpop.f32.mrf.mxu0 }
 0x323   :  { %v6060_v4 = vpop.f32.mrf.mxu1 }
 0x324   :  { %v9930_v16 = vpop.f32.mrf.mxu0  ;;  %v6061_v9 = vadd.f32 %v6060_v4, %v5978_v6 }
 0x325   :  { %v6062_v19 = vpop.f32.mrf.mxu1 }
 0x326   :  { %v9932_v32 = vpop.f32.mrf.mxu0 }
 0x327   :  { %v6213_v28 = vpop.f32.mrf.mxu1 }
 0x328   :  { %v6450_v31 = vpop.f32.mrf.mxu0 }
 0x329   :  { %v9934_v44 = vpop.f32.mrf.mxu1 }
 0x32a   :  { %v6452_v5 = vpop.f32.mrf.mxu0 }
 0x32b   :  { %v9936_v60 = vpop.f32.mrf.mxu1 }
 0x32c   :  { %v6609_v47 = vpop.f32.mrf.mxu0 }
 0x32d   :  { %v9938_v58 = vpop.f32.mrf.mxu1 }
 0x32e   :  { %10076 = vst [vmem:[#allocation26_spill] sm:$0xff] %v9938_v58  ;;  %v6611_v42 = vpop.f32.mrf.mxu0 }
 0x32f   :  { %v6532_v30 = vpop.f32.mrf.mxu1 }
 0x330   :  { %v9940_v21 = vpop.f32.mrf.mxu0  ;;  %v6533_v13 = vadd.f32 %v6532_v30, %v6450_v31 }
 0x331   :  { %v6534_v2 = vpop.f32.mrf.mxu1 }
 0x332   :  { %v9942_v22 = vpop.f32.mrf.mxu0  ;;  %v6535_v58 = vadd.f32 %v6534_v2, %v6452_v5  ;;  %v6610_v48 = vadd.f32 %v6609_v47, %v6533_v13 }
 0x333   :  { %v6685_v63 = vpop.f32.mrf.mxu1 }
 0x334   :  { %v6930_v10 = vpop.f32.mrf.mxu0  ;;  %v6612_v31 = vadd.f32 %v6611_v42, %v6535_v58 }
 0x335   :  { %v9944_v14 = vpop.f32.mrf.mxu1 }
 0x336   :  { %v6932_v26 = vpop.f32.mrf.mxu0 }
 0x337   :  { %v9946_v52 = vpop.f32.mrf.mxu1 }
 0x338   :  { %10077 = vst [vmem:[#allocation22_spill] sm:$0xff] %v9946_v52  ;;  %v7089_v17 = vpop.f32.mrf.mxu0  ;;  %v5660_v52 = vadd.f32 %v9916_v25, %v5583_v45 }
 0x339   :  { %v9948_v33 = vpop.f32.mrf.mxu1 }
 0x33a   :  { %10078 = vst [vmem:[#allocation25_spill] sm:$0xff] %v9948_v33  ;;  %v7091_v34 = vpop.f32.mrf.mxu0  ;;  %v6063_v33 = vadd.f32 %v6062_v19, %v5980_v40  ;;  %v5736_v4 = vadd.f32 %v9924_v11, %v5660_v52 }
 0x33b   :  { %v7012_v27 = vpop.f32.mrf.mxu1 }
 0x33c   :  { %v9950_v54 = vpop.f32.mrf.mxu0  ;;  %v7013_v3 = vadd.f32 %v7012_v27, %v6930_v10  ;;  %v5812_v10 = vadd.f32 %v9918_v20, %v5734_v62 }
 0x33d   :  { %10079 = vst [vmem:[#allocation5_spill] sm:$0xff] %v9950_v54  ;;  %v7014_v57 = vpop.f32.mrf.mxu1 }
 0x33e   :  { %v9952_v46 = vpop.f32.mrf.mxu0  ;;  %v7015_v50 = vadd.f32 %v7014_v57, %v6932_v26  ;;  %v7090_v25 = vadd.f32 %v7089_v17, %v7013_v3  ;;  %v5814_v57 = vadd.f32 %v9920_v36, %v5736_v4  ;;  %v6688_v3 = vadd.f32 %v9944_v14, %v6612_v31 }
 0x33f   :  { %10080 = vst [vmem:[#allocation6_spill] sm:$0xff] %v9952_v46  ;;  %v7165_v18 = vpop.f32.mrf.mxu1  ;;  %v5886_v20 = vadd.f32 %v9926_v29, %v5812_v10 }
 0x340   :  { %v7410_v1 = vpop.f32.mrf.mxu0  ;;  %v7092_v13 = vadd.f32 %v7091_v34, %v7015_v50 }
 0x341   :  { %v7167_v24 = vpop.f32.mrf.mxu1  ;;  %v10090_v62 = vld [vmem:[#allocation25_spill] sm:$0xff] }
 0x342   :  { %v7412_v0 = vpop.f32.mrf.mxu0  ;;  %v7168_v34 = vadd.f32 %v7167_v24, %v7092_v13 }
 0x343   :  { %v9954_v43 = vpop.f32.mrf.mxu1 }
 0x344   :  { %10081 = vst [vmem:[#allocation7_spill] sm:$0xff] %v9954_v43  ;;  %v7569_v56 = vpop.f32.mrf.mxu0 }
 0x345   :  { %v9956_v38 = vpop.f32.mrf.mxu1 }
 0x346   :  { %10082 = vst [vmem:[#allocation9_spill] sm:$0xff] %v9956_v38  ;;  %v7571_v35 = vpop.f32.mrf.mxu0  ;;  %v6138_v38 = vadd.f32 %v6137_v37, %v6061_v9  ;;  %v10088_v9 = vld [vmem:[#allocation6_spill] sm:$0xff] }
 0x347   :  { %v7492_v15 = vpop.f32.mrf.mxu1 }
 0x348   :  { %v9958_v61 = vpop.f32.mrf.mxu0  ;;  %v7493_v23 = vadd.f32 %v7492_v15, %v7410_v1  ;;  %v6214_v19 = vadd.f32 %v6213_v28, %v6138_v38  ;;  %v7166_v28 = vadd.f32 %v7165_v18, %v7090_v25  ;;  %v6766_v18 = vadd.f32 %v9942_v22, %v6688_v3 }
 0x349   :  { %v7494_v51 = vpop.f32.mrf.mxu1 }
 0x34a   :  { %v9960_v8 = vpop.f32.mrf.mxu0  ;;  %v7495_v5 = vadd.f32 %v7494_v51, %v7412_v0  ;;  %v7570_v26 = vadd.f32 %v7569_v56, %v7493_v23  ;;  %v6292_v11 = vadd.f32 %v9930_v16, %v6214_v19  ;;  %v5888_v16 = vadd.f32 %v9928_v39, %v5814_v57  ;;  %v10084_v56 = vld [vmem:[#allocation5_spill] sm:$0xff] }
 0x34b   :  { %10083 = vst [vmem:[#allocation8_spill] sm:$0xff] %v9960_v8  ;;  %v7645_v12 = vpop.f32.mrf.mxu1  ;;  %v6140_v8 = vadd.f32 %v6139_v41, %v6063_v33  ;;  %v6686_v41 = vadd.f32 %v6685_v63, %v6610_v48  ;;  %v7244_v38 = vadd.f32 %v10084_v56, %v7166_v28  ;;  %v6840_v48 = vadd.f32 %v10090_v62, %v6766_v18 }
 0x34c   :  { %v7890_v59 = vpop.f32.mrf.mxu0  ;;  %v7572_v42 = vadd.f32 %v7571_v35, %v7495_v5  ;;  %v7646_v0 = vadd.f32 %v7645_v12, %v7570_v26  ;;  %v6366_v14 = vadd.f32 %v9936_v60, %v6292_v11  ;;  %v7246_v12 = vadd.f32 %v10088_v9, %v7168_v34 }
 0x34d   :  { %v7647_v46 = vpop.f32.mrf.mxu1  ;;  %v6216_v53 = vadd.f32 %v9934_v44, %v6140_v8  ;;  %v6764_v63 = vadd.f32 %v9940_v21, %v6686_v41  ;;  %v10086_v21 = vld [vmem:[#allocation26_spill] sm:$0xff]  ;;  %v5891_v22 = vadd.f32 %v5888_v16, %v10089_v49 }
 0x34e   :  { %v7892_v43 = vpop.f32.mrf.mxu0  ;;  %v7648_v15 = vadd.f32 %v7647_v46, %v7572_v42  ;;  %v10087_v8 = vld [vmem:[#allocation22_spill] sm:$0xff]  ;;  %v7724_v39 = vadd.f32 %v9958_v61, %v7646_v0  ;;  %v10091_v46 = vld [vmem:[#allocation7_spill] sm:$0xff] }
 0x34f   :  { %v9963_v54 = vpop.f32.mrf.mxu1  ;;  %v6294_v44 = vadd.f32 %v9932_v32, %v6216_v53  ;;  %v10085_v32 = vld [vmem:[#allocation23_spill] sm:$0xff]  ;;  %v6838_v45 = vadd.f32 %v10087_v8, %v6764_v63  ;;  %v7318_v50 = vadd.f32 %v10091_v46, %v7244_v38 }
 0x350   :  { %v8049_v55 = vpop.f32.mrf.mxu0  ;;  %v5890_v51 = vadd.f32 %v5886_v20, %v10085_v32  ;;  %v7798_v61 = vadd.f32 %v9963_v54, %v7724_v39 }
 0x351   :  { %v9966_v6 = vpop.f32.mrf.mxu1  ;;  %v6368_v24 = vadd.f32 %v10086_v21, %v6294_v44 }
 0x352   :  { %v8051_v40 = vpop.f32.mrf.mxu0  ;;  %v10092_v4 = vld [vmem:[#allocation8_spill] sm:$0xff] }
 0x353   :  { %v7972_v37 = vpop.f32.mrf.mxu1  ;;  %v7726_v19 = vadd.f32 %v10092_v4, %v7648_v15  ;;  %v8827_v15 = vld [vmem:[%s10002_s0] sm:$0xff] }
 0x354   :  { %v7973_v30 = vadd.f32 %v7972_v37, %v7890_v59  ;;  %v8203_v2 = vpop.f32.mrf.mxu0  ;;  %v6371_v37 = vadd.f32 %v6368_v24, %v5891_v22 }
 0x355   :  { %v7974_v47 = vpop.f32.mrf.mxu1  ;;  %v7800_v3 = vadd.f32 %v9966_v6, %v7726_v19  ;;  %v8768_v6 = vpop.permute.xlu0 %8767 }
 0x356   :  { %v7975_v33 = vadd.f32 %v7974_v47, %v7892_v43  ;;  %v8205_v27 = vpop.f32.mrf.mxu0  ;;  %v8050_v52 = vadd.f32 %v8049_v55, %v7973_v30  ;;  %v6370_v55 = vadd.f32 %v6366_v14, %v5890_v51  ;;  %v10093_v30 = vld [vmem:[#allocation9_spill] sm:$0xff]  ;;  %v6843_v26 = vadd.f32 %v6840_v48, %v6371_v37 }
 0x357   :  { %v8125_v58 = vpop.f32.mrf.mxu1  ;;  %v7320_v10 = vadd.f32 %v10093_v30, %v7246_v12 }
 0x358   :  { %v8370_v17 = vpop.f32.mrf.mxu0  ;;  %v8052_v43 = vadd.f32 %v8051_v40, %v7975_v33  ;;  %v8126_v29 = vadd.f32 %v8125_v58, %v8050_v52  ;;  %v6842_v5 = vadd.f32 %v6838_v45, %v6370_v55 }
 0x359   :  { %v8127_v1 = vpop.f32.mrf.mxu1  ;;  %v7323_v42 = vadd.f32 %v7320_v10, %v6843_v26 }
 0x35a   :  { %v8372_v36 = vpop.f32.mrf.mxu0  ;;  %v8128_v60 = vadd.f32 %v8127_v1, %v8052_v43  ;;  %v8204_v31 = vadd.f32 %v8203_v2, %v8126_v29  ;;  %v7322_v33 = vadd.f32 %v7318_v50, %v6842_v5 }
 0x35b   :  { %v8277_v35 = vpop.f32.mrf.mxu1 }
 0x35c   :  { %v8529_v7 = vpop.f32.mrf.mxu0  ;;  %v8206_v41 = vadd.f32 %v8205_v27, %v8128_v60  ;;  %v8278_v28 = vadd.f32 %v8277_v35, %v8204_v31  ;;  %v7803_v27 = vadd.f32 %v7800_v3, %v7323_v42 }
 0x35d   :  { %v8279_v59 = vpop.f32.mrf.mxu1 }
 0x35e   :  { %v8531_v40 = vpop.f32.mrf.mxu0  ;;  %v8280_v20 = vadd.f32 %v8279_v59, %v8206_v41 }
 0x35f   :  { %v8452_v23 = vpop.f32.mrf.mxu1 }
 0x360   :  { %v8453_v25 = vadd.f32 %v8452_v23, %v8370_v17  ;;  %v7802_v17 = vadd.f32 %v7798_v61, %v7322_v33  ;;  %v8283_v16 = vadd.f32 %v8280_v20, %v7803_v27 }
 0x361   :  { %v8454_v53 = vpop.f32.mrf.mxu1  ;;  %v8683_v11 = vpop.f32.mrf.mxu0 }
 0x362   :  { %v8455_v13 = vadd.f32 %v8454_v53, %v8372_v36  ;;  %v8530_v47 = vadd.f32 %v8529_v7, %v8453_v25  ;;  %v8282_v1 = vadd.f32 %v8278_v28, %v7802_v17  ;;  %v8828_v7 = vld [vmem:[%s10002_s0 + $0x8] sm:$0xff] }
 0x363   :  { %v8605_v57 = vpop.f32.mrf.mxu1  ;;  %v8685_v34 = vpop.f32.mrf.mxu0 }
 0x364   :  { %v8532_v58 = vadd.f32 %v8531_v40, %v8455_v13  ;;  %v8606_v2 = vadd.f32 %v8605_v57, %v8530_v47 }
 0x365   :  { %v8607_v52 = vpop.f32.mrf.mxu1 }
 0x366   :  { %v8608_v44 = vadd.f32 %v8607_v52, %v8532_v58  ;;  %v8684_v63 = vadd.f32 %v8683_v11, %v8606_v2 }
 0x367   :  { %v8757_v54 = vpop.f32.mrf.mxu1 }
 0x368   :  { %v8686_v0 = vadd.f32 %v8685_v34, %v8608_v44  ;;  %v8758_v43 = vadd.f32 %v8757_v54, %v8684_v63 }
 0x369   :  { %v8759_v36 = vpop.f32.mrf.mxu1 }
 0x36a   :  { %v8762_v14 = vadd.f32 %v8758_v43, %v8282_v1  ;;  %v8760_v18 = vadd.f32 %v8759_v36, %v8686_v0 }
 0x36c   :  { %v8770_v56 = vadd.f32 %v8768_v6, %v8762_v14  ;;  %v8763_v38 = vadd.f32 %v8760_v18, %v8283_v16 }
 0x36e   :  { %v8771_v35 = vadd.f32 %v8768_v6, %v8763_v38  ;;  %v8772_v29 = vadd.f32 %v8827_v15, %v8770_v56 }
 0x370   :  { %v8773_v32 = vadd.f32 %v8828_v7, %v8771_v35  ;;  %v8774_v51 = vmax.f32 %v8772_v29, 0.0 }
 0x372   :  { %v8775_v21 = vmax.f32 %v8773_v32, 0.0  ;;  %8776 = vst [vmem:[#allocation2] sm:$0xff] %v8774_v51 }
 0x374   :  { %8777 = vst [vmem:[#allocation2 + $0x8] sm:$0xff] %v8775_v21 }
 0x375   :  { %8840 = shalt.err (!%p8837_p4)
}
 0x376   :  { %8787 = dma.vmem_to_hbm [thread:$0]  %s8785_s21, 256, %s10008_s6, [#allocation3]  }
 0x377   :  { %8849 = dma.done.wait [#allocation3], 256  }
 0x378   :  { %8850 = vsyncadd [#allocation3], 4294967040 }
 0x379   :  { %8791 = vsyncpa [#allocation3], 1 }

</bundles_post_ra>
